<compile_context>
chip_gen: v7x
topology: tpu7x:2x2x1
jax: 0.10.0
libtpu: 0.0.40
codegen_flags: <defaults>
</compile_context>

<pallas_src>
import functools

import jax
import jax.numpy as jnp
from jax import lax
from jax.experimental import pallas as pl
from jax.experimental.pallas import tpu as pltpu

LN_EPS = 1e-5
_MIB = 1024 * 1024


# ----------------------------------------------------------------------------
# Kernels
# ----------------------------------------------------------------------------
def _layer_norm(r, g, b):
    mean = jnp.mean(r, axis=-1, keepdims=True)
    cent = r - mean
    var = jnp.mean(cent * cent, axis=-1, keepdims=True)
    return cent * lax.rsqrt(var + LN_EPS) * g + b


def ffn_kernel_fused(x_ref, w1_ref, b1_ref, w2_ref, b2_ref, g_ref, beta_ref,
                     o_ref):
    """Single H step (weights fully resident): no accumulator round-trip."""
    x = x_ref[...]                                                   # (tm, D)
    h = jnp.dot(x.astype(w1_ref.dtype), w1_ref[...],
                preferred_element_type=jnp.float32)                  # (tm, H)
    h = jnp.maximum(h + b1_ref[...], 0.0)
    y = jnp.dot(h.astype(w2_ref.dtype), w2_ref[...],
                preferred_element_type=jnp.float32)                  # (tm, D)
    r = y + b2_ref[...] + x.astype(jnp.float32)
    o_ref[...] = _layer_norm(r, g_ref[...], beta_ref[...]).astype(o_ref.dtype)


def ffn_kernel_acc(x_ref, w1_ref, b1_ref, w2_ref, b2_ref, g_ref, beta_ref,
                   o_ref, acc_ref):
    """Streaming H tiles: accumulate fc2 partials into an f32 VMEM scratch."""
    h_idx = pl.program_id(1)

    x = x_ref[...]                                                   # (tm, D)
    h = jnp.dot(x.astype(w1_ref.dtype), w1_ref[...],
                preferred_element_type=jnp.float32)                  # (tm, th)
    h = jnp.maximum(h + b1_ref[...], 0.0)
    contrib = jnp.dot(h.astype(w2_ref.dtype), w2_ref[...],
                      preferred_element_type=jnp.float32)            # (tm, D)

    @pl.when(h_idx == 0)
    def _first():                      # direct write: saves zero-init + add
        acc_ref[...] = contrib

    @pl.when(h_idx > 0)
    def _rest():
        acc_ref[...] += contrib

    @pl.when(h_idx == pl.num_programs(1) - 1)
    def _finalize():
        r = acc_ref[...] + b2_ref[...] + x.astype(jnp.float32)
        o_ref[...] = _layer_norm(r, g_ref[...], beta_ref[...]).astype(o_ref.dtype)


# ----------------------------------------------------------------------------
# VMEM-budget-aware tile selection
# ----------------------------------------------------------------------------
def _vmem_capacity_bytes(default=64 * _MIB):
    try:
        info = pltpu.get_tpu_info()
    except Exception:
        return default
    for attr in ("vmem_capacity_bytes", "vmem_bytes", "vmem_size_bytes"):
        v = getattr(info, attr, None)
        if v:
            try:
                v = int(v)
            except Exception:
                continue
            if v > 0:
                return v
    return default


def _vmem_usage_bytes(tm, th, d, x_bytes, mm_bytes, out_bytes):
    # Conservative: assume everything Pallas pipelines is double-buffered.
    use = 2 * tm * d * x_bytes            # x row tiles
    use += 2 * tm * d * out_bytes         # output row tiles
    use += tm * d * 4                     # f32 accumulator scratch
    use += 2 * d * th * mm_bytes          # W1 tiles
    use += 2 * th * d * mm_bytes          # W2 tiles
    use += 2 * (th + 3 * d) * 4           # b1 / b2 / gamma / beta rows
    return use


def _select_tiles(m, d, h, x_bytes, mm_bytes, out_bytes, budget):
    tm_cands = [c for c in (2048, 1024, 512, 256, 128, 64, 32, 16, 8)
                if m % c == 0]
    if x_bytes < 4:  # bf16 packs 16 sublanes/vreg: avoid tm < 16 row tiles
        tm_cands = [c for c in tm_cands if c >= 16] or tm_cands
    if not tm_cands:
        tm_cands = [m]
    # Prefer full weight residency (th = H), then the fattest streaming tile.
    th_cands = [h] + [c for c in (2048, 1024, 512, 256, 128)
                      if c < h and h % c == 0]
    tm_floor = max((c for c in tm_cands if c <= 256), default=tm_cands[-1])
    for th in th_cands:
        for tm in tm_cands:               # descending: largest fitting tm wins
            if tm < tm_floor:
                break
            if _vmem_usage_bytes(tm, th, d, x_bytes, mm_bytes, out_bytes) <= budget:
                return tm, th
    return tm_cands[-1], th_cands[-1]     # smallest-footprint fallback


# ----------------------------------------------------------------------------
# Wrapper
# ----------------------------------------------------------------------------
@functools.partial(jax.jit, static_argnames=("tm", "th", "matmul_dtype"))
def position_wise_feed_forward(x, w1, b1, w2, b2, gamma, beta, *,
                               tm=None, th=None, matmul_dtype=None):
    B, S, D = x.shape
    H = w1.shape[1]
    M = B * S
    x2 = x.reshape(M, D)

    mm_dtype = x.dtype if matmul_dtype is None else jnp.dtype(matmul_dtype)
    w1c = w1.astype(mm_dtype)
    w2c = w2.astype(mm_dtype)

    x_bytes = jnp.dtype(x.dtype).itemsize
    mm_bytes = jnp.dtype(mm_dtype).itemsize
    out_bytes = x_bytes

    cap = _vmem_capacity_bytes()                 # 128 MiB v5e/v6e, 64 MiB v7x
    vmem_limit = (cap * 3) // 4                  # headroom for Mosaic scratch
    budget = max(vmem_limit - 8 * _MIB, 16 * _MIB)

    auto_tm, auto_th = _select_tiles(M, D, H, x_bytes, mm_bytes, out_bytes,
                                     budget)
    tm = auto_tm if tm is None else tm
    th = auto_th if th is None else th
    assert M % tm == 0 and H % th == 0, (M, tm, H, th)

    # Biases / LN params as (1, dim) f32 rows (epilogue math stays in f32).
    b1_2 = b1.reshape(1, H).astype(jnp.float32)
    b2_2 = b2.reshape(1, D).astype(jnp.float32)
    g_2 = gamma.reshape(1, D).astype(jnp.float32)
    be_2 = beta.reshape(1, D).astype(jnp.float32)

    h_steps = H // th

    if h_steps == 1:
        # Weights resident in VMEM: constant index maps -> DMA'd exactly once.
        grid = (M // tm,)
        in_specs = [
            pl.BlockSpec((tm, D), lambda i: (i, 0)),   # x rows
            pl.BlockSpec((D, H), lambda i: (0, 0)),    # W1 (resident)
            pl.BlockSpec((1, H), lambda i: (0, 0)),    # b1
            pl.BlockSpec((H, D), lambda i: (0, 0)),    # W2 (resident)
            pl.BlockSpec((1, D), lambda i: (0, 0)),    # b2
            pl.BlockSpec((1, D), lambda i: (0, 0)),    # gamma
            pl.BlockSpec((1, D), lambda i: (0, 0)),    # beta
        ]
        out_specs = pl.BlockSpec((tm, D), lambda i: (i, 0))
        scratch_shapes = []
        kernel = ffn_kernel_fused
        dims = ("parallel",)
    else:
        # Stream H tiles; rows resident across the reduction axis.
        grid = (M // tm, h_steps)
        in_specs = [
            pl.BlockSpec((tm, D), lambda i, h: (i, 0)),   # x rows
            pl.BlockSpec((D, th), lambda i, h: (0, h)),   # W1 column tile
            pl.BlockSpec((1, th), lambda i, h: (0, h)),   # b1 tile
            pl.BlockSpec((th, D), lambda i, h: (h, 0)),   # W2 row tile
            pl.BlockSpec((1, D), lambda i, h: (0, 0)),    # b2 (epilogue)
            pl.BlockSpec((1, D), lambda i, h: (0, 0)),    # gamma
            pl.BlockSpec((1, D), lambda i, h: (0, 0)),    # beta
        ]
        out_specs = pl.BlockSpec((tm, D), lambda i, h: (i, 0))
        scratch_shapes = [pltpu.VMEM((tm, D), jnp.float32)]
        kernel = ffn_kernel_acc
        dims = ("parallel", "arbitrary")

    out2 = pl.pallas_call(
        kernel,
        out_shape=jax.ShapeDtypeStruct((M, D), x.dtype),
        grid_spec=pltpu.PrefetchScalarGridSpec(
            num_scalar_prefetch=0,
            grid=grid,
            in_specs=in_specs,
            out_specs=out_specs,
            scratch_shapes=scratch_shapes),
        compiler_params=pltpu.CompilerParams(
            dimension_semantics=dims,
            vmem_limit_bytes=int(vmem_limit)),
    )(x2, w1c, b1_2, w2c, b2_2, g_2, be_2)

    return out2.reshape(B, S, D)


# ----------------------------------------------------------------------------
# Reference + test
# ----------------------------------------------------------------------------
def reference_ffn(x, w1, b1, w2, b2, gamma, beta):
    x = x.astype(jnp.float32)
    h = jnp.maximum(x @ w1.astype(jnp.float32) + b1, 0.0)
    y = h @ w2.astype(jnp.float32) + b2
    r = y + x
    mean = jnp.mean(r, axis=-1, keepdims=True)
    var = jnp.mean((r - mean) ** 2, axis=-1, keepdims=True)
    return (r - mean) / jnp.sqrt(var + LN_EPS) * gamma + beta


if __name__ == "__main__":
    # Small lane-dense shapes: dim_model=128, hidden=2*dim_model.
    B, S, D, H = 2, 128, 128, 256   # M = 256 rows

    key = jax.random.PRNGKey(0)
    kx, k1, k2, k3, k4 = jax.random.split(key, 5)

    x = jax.random.normal(kx, (B, S, D), dtype=jnp.float32)

    # Deterministic parameter init (roughly nn.Linear fan-in scaling).
    w1 = jax.random.uniform(k1, (D, H), jnp.float32, -1.0, 1.0) / jnp.sqrt(D)
    b1 = jax.random.uniform(k2, (H,), jnp.float32, -1.0, 1.0) / jnp.sqrt(D)
    w2 = jax.random.uniform(k3, (H, D), jnp.float32, -1.0, 1.0) / jnp.sqrt(H)
    b2 = jax.random.uniform(k4, (D,), jnp.float32, -1.0, 1.0) / jnp.sqrt(H)
    gamma = jnp.ones((D,), jnp.float32)   # LayerNorm weight init
    beta = jnp.zeros((D,), jnp.float32)   # LayerNorm bias init

    ref = reference_ffn(x, w1, b1, w2, b2, gamma, beta)

    # 1) f32 path, weights resident (fused single-step kernel).
    out = position_wise_feed_forward(x, w1, b1, w2, b2, gamma, beta)
    out = jax.block_until_ready(out)
    assert out.shape == (B, S, D)
    assert jnp.allclose(out, ref, atol=1e-4, rtol=1e-4), "f32 fused mismatch"

    # 2) f32 path with forced H streaming (exercises the accumulator kernel).
    out_stream = position_wise_feed_forward(x, w1, b1, w2, b2, gamma, beta,
                                            th=128)
    out_stream = jax.block_until_ready(out_stream)
    assert jnp.allclose(out_stream, ref, atol=1e-4, rtol=1e-4), \
        "f32 streaming mismatch"

    # 3) bf16 matmul operands (MXU-rate), f32 accumulation / residual / LN.
    out_bf16 = position_wise_feed_forward(x, w1, b1, w2, b2, gamma, beta,
                                          matmul_dtype=jnp.bfloat16)
    out_bf16 = jax.block_until_ready(out_bf16)
    assert jnp.allclose(out_bf16, ref, atol=1e-1, rtol=1e-1), \
        "bf16-operand mismatch"

    print("KERNEL_OK")
</pallas_src>

<mosaic_0001>
module attributes {stable_mosaic.version = 11 : i64} {
  func.func @ffn_kernel_fused(%arg0: i32, %arg1: memref<256x128xf32, #tpu.memory_space<vmem>>, %arg2: memref<128x256xf32, #tpu.memory_space<vmem>>, %arg3: memref<1x256xf32, #tpu.memory_space<vmem>>, %arg4: memref<256x128xf32, #tpu.memory_space<vmem>>, %arg5: memref<1x128xf32, #tpu.memory_space<vmem>>, %arg6: memref<1x128xf32, #tpu.memory_space<vmem>>, %arg7: memref<1x128xf32, #tpu.memory_space<vmem>>, %arg8: memref<256x128xf32, #tpu.memory_space<vmem>>) attributes {dimension_semantics = [#tpu.dimension_semantics<parallel>], iteration_bounds = array<i64: 1>, scalar_prefetch = 0 : i64, scratch_operands = 0 : i64, tpu.core_type = #tpu.core_type<tc>, window_params = [{transform_indices = @transform_0, window_bounds = array<i64: 256, 128>}, {pipeline_mode = #tpu.pipeline_mode<synchronous>, transform_indices = @transform_1, window_bounds = array<i64: 128, 256>}, {pipeline_mode = #tpu.pipeline_mode<synchronous>, transform_indices = @transform_2, window_bounds = array<i64: 1, 256>}, {pipeline_mode = #tpu.pipeline_mode<synchronous>, transform_indices = @transform_3, window_bounds = array<i64: 256, 128>}, {pipeline_mode = #tpu.pipeline_mode<synchronous>, transform_indices = @transform_4, window_bounds = array<i64: 1, 128>}, {pipeline_mode = #tpu.pipeline_mode<synchronous>, transform_indices = @transform_5, window_bounds = array<i64: 1, 128>}, {pipeline_mode = #tpu.pipeline_mode<synchronous>, transform_indices = @transform_6, window_bounds = array<i64: 1, 128>}, {transform_indices = @transform_7, window_bounds = array<i64: 256, 128>}]} {
    %c0 = arith.constant 0 : index
    %c0_0 = arith.constant 0 : index
    %0 = vector.load %arg1[%c0, %c0_0] : memref<256x128xf32, #tpu.memory_space<vmem>>, vector<256x128xf32>
    %c0_1 = arith.constant 0 : index
    %c0_2 = arith.constant 0 : index
    %1 = vector.load %arg2[%c0_1, %c0_2] : memref<128x256xf32, #tpu.memory_space<vmem>>, vector<128x256xf32>
    %cst = arith.constant dense<0.000000e+00> : vector<256x256xf32>
    %2 = tpu.matmul %0, %1, %cst {dimension_numbers = #tpu.dot_dimension_numbers<[1], [0], [0], [1], [0, 0, 1, 1], [], []>} : vector<256x128xf32>, vector<128x256xf32>, vector<256x256xf32> -> vector<256x256xf32>
    %c0_3 = arith.constant 0 : index
    %c0_4 = arith.constant 0 : index
    %3 = vector.load %arg3[%c0_3, %c0_4] : memref<1x256xf32, #tpu.memory_space<vmem>>, vector<1x256xf32>
    %4 = vector.broadcast %3 : vector<1x256xf32> to vector<256x256xf32>
    %5 = arith.addf %2, %4 : vector<256x256xf32>
    %cst_5 = arith.constant 0.000000e+00 : f32
    %6 = vector.broadcast %cst_5 : f32 to vector<256x256xf32>
    %7 = arith.maximumf %5, %6 : vector<256x256xf32>
    %c0_6 = arith.constant 0 : index
    %c0_7 = arith.constant 0 : index
    %8 = vector.load %arg4[%c0_6, %c0_7] : memref<256x128xf32, #tpu.memory_space<vmem>>, vector<256x128xf32>
    %cst_8 = arith.constant dense<0.000000e+00> : vector<256x128xf32>
    %9 = tpu.matmul %7, %8, %cst_8 {dimension_numbers = #tpu.dot_dimension_numbers<[1], [0], [0], [1], [0, 0, 1, 1], [], []>} : vector<256x256xf32>, vector<256x128xf32>, vector<256x128xf32> -> vector<256x128xf32>
    %c0_9 = arith.constant 0 : index
    %c0_10 = arith.constant 0 : index
    %10 = vector.load %arg5[%c0_9, %c0_10] : memref<1x128xf32, #tpu.memory_space<vmem>>, vector<1x128xf32>
    %11 = vector.broadcast %10 : vector<1x128xf32> to vector<256x128xf32>
    %12 = arith.addf %9, %11 : vector<256x128xf32>
    %13 = arith.addf %12, %0 : vector<256x128xf32>
    %c0_11 = arith.constant 0 : index
    %c0_12 = arith.constant 0 : index
    %14 = vector.load %arg6[%c0_11, %c0_12] : memref<1x128xf32, #tpu.memory_space<vmem>>, vector<1x128xf32>
    %c0_13 = arith.constant 0 : index
    %c0_14 = arith.constant 0 : index
    %15 = vector.load %arg7[%c0_13, %c0_14] : memref<1x128xf32, #tpu.memory_space<vmem>>, vector<1x128xf32>
    %cst_15 = arith.constant dense<0.000000e+00> : vector<256xf32>
    %16 = vector.multi_reduction <add>, %13, %cst_15 [1] : vector<256x128xf32> to vector<256xf32>
    %17 = vector.shape_cast %16 : vector<256xf32> to vector<256x1xf32>
    %cst_16 = arith.constant 1.280000e+02 : f32
    %18 = vector.broadcast %cst_16 : f32 to vector<256x1xf32>
    %19 = arith.divf %17, %18 : vector<256x1xf32>
    %20 = vector.broadcast %19 : vector<256x1xf32> to vector<256x128xf32>
    %21 = arith.subf %13, %20 : vector<256x128xf32>
    %22 = arith.mulf %21, %21 : vector<256x128xf32>
    %cst_17 = arith.constant dense<0.000000e+00> : vector<256xf32>
    %23 = vector.multi_reduction <add>, %22, %cst_17 [1] : vector<256x128xf32> to vector<256xf32>
    %24 = vector.shape_cast %23 : vector<256xf32> to vector<256x1xf32>
    %cst_18 = arith.constant 1.280000e+02 : f32
    %25 = vector.broadcast %cst_18 : f32 to vector<256x1xf32>
    %26 = arith.divf %24, %25 : vector<256x1xf32>
    %cst_19 = arith.constant 9.99999974E-6 : f32
    %27 = vector.broadcast %cst_19 : f32 to vector<256x1xf32>
    %28 = arith.addf %26, %27 : vector<256x1xf32>
    %29 = math.rsqrt %28 : vector<256x1xf32>
    %30 = vector.broadcast %29 : vector<256x1xf32> to vector<256x128xf32>
    %31 = arith.mulf %21, %30 : vector<256x128xf32>
    %32 = vector.broadcast %14 : vector<1x128xf32> to vector<256x128xf32>
    %33 = arith.mulf %31, %32 : vector<256x128xf32>
    %34 = vector.broadcast %15 : vector<1x128xf32> to vector<256x128xf32>
    %35 = arith.addf %33, %34 : vector<256x128xf32>
    %c0_20 = arith.constant 0 : index
    %c0_21 = arith.constant 0 : index
    %36 = vector.load %arg8[%c0_20, %c0_21] : memref<256x128xf32, #tpu.memory_space<vmem>>, vector<256x128xf32>
    tpu.vector_store %arg8[%c0_20, %c0_21], %35 {strides = array<i32>} : memref<256x128xf32, #tpu.memory_space<vmem>>, vector<256x128xf32>,
    return
  }
  func.func @transform_0(%arg0: i32) -> (i32, i32) {
    %c0_i32 = arith.constant 0 : i32
    %c0_i32_0 = arith.constant 0 : i32
    return %arg0, %c0_i32 : i32, i32
  }
  func.func @transform_1(%arg0: i32) -> (i32, i32) {
    %c0_i32 = arith.constant 0 : i32
    %c0_i32_0 = arith.constant 0 : i32
    %c0_i32_1 = arith.constant 0 : i32
    return %c0_i32, %c0_i32_0 : i32, i32
  }
  func.func @transform_2(%arg0: i32) -> (i32, i32) {
    %c0_i32 = arith.constant 0 : i32
    %c0_i32_0 = arith.constant 0 : i32
    %c0_i32_1 = arith.constant 0 : i32
    return %c0_i32, %c0_i32_0 : i32, i32
  }
  func.func @transform_3(%arg0: i32) -> (i32, i32) {
    %c0_i32 = arith.constant 0 : i32
    %c0_i32_0 = arith.constant 0 : i32
    %c0_i32_1 = arith.constant 0 : i32
    return %c0_i32, %c0_i32_0 : i32, i32
  }
  func.func @transform_4(%arg0: i32) -> (i32, i32) {
    %c0_i32 = arith.constant 0 : i32
    %c0_i32_0 = arith.constant 0 : i32
    %c0_i32_1 = arith.constant 0 : i32
    return %c0_i32, %c0_i32_0 : i32, i32
  }
  func.func @transform_5(%arg0: i32) -> (i32, i32) {
    %c0_i32 = arith.constant 0 : i32
    %c0_i32_0 = arith.constant 0 : i32
    %c0_i32_1 = arith.constant 0 : i32
    return %c0_i32, %c0_i32_0 : i32, i32
  }
  func.func @transform_6(%arg0: i32) -> (i32, i32) {
    %c0_i32 = arith.constant 0 : i32
    %c0_i32_0 = arith.constant 0 : i32
    %c0_i32_1 = arith.constant 0 : i32
    return %c0_i32, %c0_i32_0 : i32, i32
  }
  func.func @transform_7(%arg0: i32) -> (i32, i32) {
    %c0_i32 = arith.constant 0 : i32
    %c0_i32_0 = arith.constant 0 : i32
    return %arg0, %c0_i32 : i32, i32
  }
}

</mosaic_0001>

<bundles_post_ra>
// kernel: position_wise_feed_forward.1
= control target key start
LH: loop header
LB: loop body
LE: loop exit
PB: predicated region body
PF: predicated region fallthrough
CT: control target
= control target key end

     0   :  { %12 = vsyncpa [#allocation3], 0  ;;  %s2294_s0 = inlined_call_operand.hbm [shape: f32[256,128], index: 0, kind: input, shape index: {}]   ;;  %s2295_s1 = inlined_call_operand.hbm [shape: f32[128,256], index: 1, kind: input, shape index: {}]   ;;  %s2296_s2 = inlined_call_operand.vmem [shape: f32[1,256], index: 2, kind: input, shape index: {}]   ;;  %s2297_s3 = inlined_call_operand.hbm [shape: f32[256,128], index: 3, kind: input, shape index: {}]   ;;  %s2298_s4 = inlined_call_operand.vmem [shape: f32[1,128], index: 4, kind: input, shape index: {}]   ;;  %s2299_s5 = inlined_call_operand.vmem [shape: f32[1,128], index: 5, kind: input, shape index: {}]   ;;  %s2300_s6 = inlined_call_operand.vmem [shape: f32[1,128], index: 6, kind: input, shape index: {}]   ;;  %s2301_s7 = inlined_call_operand.hbm [shape: f32[256,128], index: 7, kind: output, shape index: {}]  }
   0x1   :  { %13 = vsyncpa [#allocation6], 0 }
   0x2   :  { %14 = vsyncpa [#allocation4], 0  ;;  %s1525_s24 = smov [#allocation5]   ;;  %s1431_s28 = scalar_lea.hbm %s2295_s1, 4096 }
   0x3   :  { %s32_s25 = sshll.u32 %s1525_s24, 4  ;;  %p1432_p0 = scmp.ne.s32.totalorder %s2295_s1, %s1431_s28  ;;  %s33_s25 = int_to_ptr.vmem [resolvable:$true] %s32_s25 }
   0x4   :  { %p1435_p1 = scmp.lt.u32.totalorder %s1431_s28, %s2295_s1 }
   0x6   :  { %p1437_p2 = pnand %p1435_p1, %p1432_p0 }
   0x8   :  { %1440 = shalt.err (!%p1437_p2)
}
   0x9   :  { %s1441_s10 = scalar_lea.vmem %s33_s25, 4096  ;;  %p1446_p4 = scmp.lt.s32.totalorder %s33_s25, %s33_s25 }
   0xa   :  { %p1442_p3 = scmp.ne.s32.totalorder %s33_s25, %s1441_s10  ;;  %p1447_p5 = scmp.lt.s32.totalorder %s1441_s10, %s1441_s10 }
   0xc   :  { %p1448_p6 = por %p1447_p5, %p1446_p4 }
   0xe   :  { %p1449_p7 = pnand %p1448_p6, %p1442_p3 }
  0x10   :  { %1452 = shalt.err (!%p1449_p7)
}
  0x11   :  { %s1526_s11 = smov 256   ;;  %s1527_s12 = smov 16  }
  0x12   :  { %38 = dma.hbm_to_vmem [thread:$0]  %s2295_s1, 4096, %s33_s25, [#allocation6], %s1526_s11, %s1526_s11, %s1527_s12  }
  0x13   :  { %s1528_s15 = smov [#allocation2]   ;;  %s1453_s19 = scalar_lea.hbm %s2294_s0, 4096 }
  0x14   :  { %s20_s16 = sshll.u32 %s1528_s15, 4  ;;  %p1454_p8 = scmp.ne.s32.totalorder %s2294_s0, %s1453_s19  ;;  %s21_s16 = int_to_ptr.vmem [resolvable:$true] %s20_s16 }
  0x15   :  { %p1457_p9 = scmp.lt.u32.totalorder %s1453_s19, %s2294_s0 }
  0x17   :  { %p1459_p10 = pnand %p1457_p9, %p1454_p8 }
  0x19   :  { %1462 = shalt.err (!%p1459_p10)
}
  0x1a   :  { %s1463_s24 = scalar_lea.vmem %s21_s16, 4096  ;;  %p1468_p12 = scmp.lt.s32.totalorder %s21_s16, %s21_s16 }
  0x1b   :  { %p1464_p11 = scmp.ne.s32.totalorder %s21_s16, %s1463_s24  ;;  %p1469_p13 = scmp.lt.s32.totalorder %s1463_s24, %s1463_s24 }
  0x1d   :  { %p1470_p0 = por %p1469_p13, %p1468_p12 }
  0x1f   :  { %p1471_p1 = pnand %p1470_p0, %p1464_p11 }
  0x21   :  { %1474 = shalt.err (!%p1471_p1)
}
  0x22   :  { %s1529_s1 = smov 128   ;;  %s1530_s25 = smov 8  }
  0x23   :  { %26 = dma.hbm_to_vmem [thread:$0]  %s2294_s0, 4096, %s21_s16, [#allocation3], %s1529_s1, %s1529_s1, %s1530_s25  }
  0x24   :  { %s1531_s28 = smov [#allocation7]   ;;  %s1475_s9 = scalar_lea.hbm %s2297_s3, 4096 }
  0x25   :  { %s46_s29 = sshll.u32 %s1531_s28, 4  ;;  %p1476_p2 = scmp.ne.s32.totalorder %s2297_s3, %s1475_s9  ;;  %s47_s29 = int_to_ptr.vmem [resolvable:$true] %s46_s29 }
  0x26   :  { %p1479_p3 = scmp.lt.u32.totalorder %s1475_s9, %s2297_s3 }
  0x28   :  { %p1481_p4 = pnand %p1479_p3, %p1476_p2 }
  0x2a   :  { %1484 = shalt.err (!%p1481_p4)
}
  0x2b   :  { %s1485_s14 = scalar_lea.vmem %s47_s29, 4096  ;;  %p1490_p6 = scmp.lt.s32.totalorder %s47_s29, %s47_s29 }
  0x2c   :  { %p1486_p5 = scmp.ne.s32.totalorder %s47_s29, %s1485_s14  ;;  %p1491_p7 = scmp.lt.s32.totalorder %s1485_s14, %s1485_s14 }
  0x2e   :  { %p1492_p8 = por %p1491_p7, %p1490_p6 }
  0x30   :  { %p1493_p9 = pnand %p1492_p8, %p1486_p5 }
  0x32   :  { %1496 = shalt.err (!%p1493_p9)
}
  0x33   :  { %52 = dma.hbm_to_vmem [thread:$0]  %s2297_s3, 4096, %s47_s29, [#allocation6], %s1529_s1, %s1529_s1, %s1530_s25  }
  0x34   :  { %1519 = dma.done.wait [#allocation3], 4096  }
  0x35   :  { %1520 = vsyncadd [#allocation3], 4294963200 }
  0x36   :  { %1521 = dma.done.wait [#allocation6], 8192  }
  0x37   :  { %1522 = vsyncadd [#allocation6], 4294959104  ;;  %v1532_v0 = vmov 0.0   ;;  %v101_v1 = vld [vmem:[#allocation5 + $0x8] sm:$0xff]  ;;  %v103_v2 = vld [vmem:[#allocation5 + $0x18] sm:$0xff]  ;;  %v1533_v53 = vmov 0.0|0.0  }
  0x38   :  { %208 = vmatprep.mubr.f32.mxu0 %v1532_v0  ;;  %v100_v3 = vld [vmem:[#allocation5] sm:$0xff]  ;;  %v1245_v4 = vpack.c.bf16 %v103_v2, %v101_v1  ;;  %v102_v5 = vld [vmem:[#allocation5 + $0x10] sm:$0xff]  ;;  %v105_v6 = vld [vmem:[#allocation5 + $0x28] sm:$0xff]  ;;  %1325 = vmatprep.subr.bf16.mxu1 %v1533_v53 }
  0x39   :  { %v107_v7 = vld [vmem:[#allocation5 + $0x38] sm:$0xff]  ;;  %v1247_v8 = vpack.c.bf16 %v102_v5, %v100_v3  ;;  %v104_v10 = vld [vmem:[#allocation5 + $0x20] sm:$0xff]  ;;  %v106_v11 = vld [vmem:[#allocation5 + $0x30] sm:$0xff] }
  0x3a   :  { %v1249_v9 = vpack.c.bf16 %v107_v7, %v105_v6  ;;  %v109_v12 = vld [vmem:[#allocation5 + $0x48] sm:$0xff]  ;;  %1246 = vmatprep.subr.bf16.mxu0 %v1245_v4  ;;  %v111_v13 = vld [vmem:[#allocation5 + $0x58] sm:$0xff]  ;;  %v1251_v14 = vpack.c.bf16 %v106_v11, %v104_v10  ;;  %v108_v16 = vld [vmem:[#allocation5 + $0x40] sm:$0xff] }
  0x3b   :  { %1248 = vmatpush1.bf16.msra.mxu0 %v1247_v8  ;;  %v1253_v15 = vpack.c.bf16 %v111_v13, %v109_v12  ;;  %v110_v17 = vld [vmem:[#allocation5 + $0x50] sm:$0xff]  ;;  %v113_v18 = vld [vmem:[#allocation5 + $0x68] sm:$0xff]  ;;  %v115_v19 = vld [vmem:[#allocation5 + $0x78] sm:$0xff] }
  0x3c   :  { %1250 = vmatprep.subr.bf16.mxu0 %v1249_v9  ;;  %v1255_v20 = vpack.c.bf16 %v110_v17, %v108_v16  ;;  %v1257_v21 = vpack.c.bf16 %v115_v19, %v113_v18  ;;  %v112_v22 = vld [vmem:[#allocation5 + $0x60] sm:$0xff]  ;;  %v114_v23 = vld [vmem:[#allocation5 + $0x70] sm:$0xff]  ;;  %v117_v24 = vld [vmem:[#allocation5 + $0x88] sm:$0xff] }
  0x3d   :  { %v119_v25 = vld [vmem:[#allocation5 + $0x98] sm:$0xff]  ;;  %v1259_v26 = vpack.c.bf16 %v114_v23, %v112_v22  ;;  %v116_v28 = vld [vmem:[#allocation5 + $0x80] sm:$0xff]  ;;  %v118_v29 = vld [vmem:[#allocation5 + $0x90] sm:$0xff] }
  0x3e   :  { %v1261_v27 = vpack.c.bf16 %v119_v25, %v117_v24  ;;  %v121_v30 = vld [vmem:[#allocation5 + $0xa8] sm:$0xff]  ;;  %v123_v31 = vld [vmem:[#allocation5 + $0xb8] sm:$0xff]  ;;  %v1263_v32 = vpack.c.bf16 %v118_v29, %v116_v28  ;;  %v120_v34 = vld [vmem:[#allocation5 + $0xa0] sm:$0xff] }
  0x3f   :  { %1252 = vmatpush1.bf16.msra.mxu0 %v1251_v14  ;;  %v1265_v33 = vpack.c.bf16 %v123_v31, %v121_v30  ;;  %v122_v35 = vld [vmem:[#allocation5 + $0xb0] sm:$0xff]  ;;  %v125_v36 = vld [vmem:[#allocation5 + $0xc8] sm:$0xff]  ;;  %v127_v37 = vld [vmem:[#allocation5 + $0xd8] sm:$0xff] }
  0x40   :  { %1254 = vmatprep.subr.bf16.mxu0 %v1253_v15  ;;  %v1267_v38 = vpack.c.bf16 %v122_v35, %v120_v34  ;;  %v1269_v39 = vpack.c.bf16 %v127_v37, %v125_v36  ;;  %v124_v40 = vld [vmem:[#allocation5 + $0xc0] sm:$0xff]  ;;  %v126_v41 = vld [vmem:[#allocation5 + $0xd0] sm:$0xff]  ;;  %v129_v42 = vld [vmem:[#allocation5 + $0xe8] sm:$0xff] }
  0x41   :  { %v131_v43 = vld [vmem:[#allocation5 + $0xf8] sm:$0xff]  ;;  %v1271_v44 = vpack.c.bf16 %v126_v41, %v124_v40  ;;  %v128_v46 = vld [vmem:[#allocation5 + $0xe0] sm:$0xff]  ;;  %v130_v47 = vld [vmem:[#allocation5 + $0xf0] sm:$0xff] }
  0x42   :  { %v1273_v45 = vpack.c.bf16 %v131_v43, %v129_v42  ;;  %v1275_v48 = vpack.c.bf16 %v130_v47, %v128_v46  ;;  %v465_v49 = vld [vmem:[#allocation7] sm:$0xff]  ;;  %v466_v50 = vld [vmem:[#allocation7 + $0x8] sm:$0xff]  ;;  %v467_v54 = vld [vmem:[#allocation7 + $0x10] sm:$0xff] }
  0x43   :  { %1256 = vmatpush1.bf16.msra.mxu0 %v1255_v20  ;;  %v1618_v51 = vld [vmem:[#allocation2] sm:$0xff]  ;;  %v1278_v52 = vpack.c.bf16 %v466_v50, %v465_v49  ;;  %v468_v55 = vld [vmem:[#allocation7 + $0x18] sm:$0xff]  ;;  %v1625_v56 = vld [vmem:[#allocation2 + $0x8] sm:$0xff] }
  0x44   :  { %1258 = vmatprep.subr.bf16.mxu0 %v1257_v21  ;;  %v1281_v57 = vpack.c.bf16 %v468_v55, %v467_v54  ;;  %v469_v58 = vld [vmem:[#allocation7 + $0x20] sm:$0xff]  ;;  %v470_v59 = vld [vmem:[#allocation7 + $0x28] sm:$0xff]  ;;  %v1631_v60 = vld [vmem:[#allocation2 + $0x10] sm:$0xff] }
  0x45   :  { %1341 = vmatpush1.bf16.msra.mxu1 %v1278_v52  ;;  %v1284_v61 = vpack.c.bf16 %v470_v59, %v469_v58  ;;  %v471_v62 = vld [vmem:[#allocation7 + $0x30] sm:$0xff]  ;;  %v472_v63 = vld [vmem:[#allocation7 + $0x38] sm:$0xff]  ;;  %v473_v3 = vld [vmem:[#allocation7 + $0x40] sm:$0xff] }
  0x46   :  { %1326 = vmatprep.subr.bf16.mxu1 %v1533_v53  ;;  %v1637_v1 = vld [vmem:[#allocation2 + $0x18] sm:$0xff]  ;;  %v1287_v2 = vpack.c.bf16 %v472_v63, %v471_v62  ;;  %v474_v4 = vld [vmem:[#allocation7 + $0x48] sm:$0xff]  ;;  %v1643_v5 = vld [vmem:[#allocation2 + $0x20] sm:$0xff] }
  0x47   :  { %1260 = vmatpush1.bf16.msra.mxu0 %v1259_v26  ;;  %v1290_v6 = vpack.c.bf16 %v474_v4, %v473_v3  ;;  %v475_v7 = vld [vmem:[#allocation7 + $0x50] sm:$0xff]  ;;  %v476_v8 = vld [vmem:[#allocation7 + $0x58] sm:$0xff]  ;;  %v1649_v9 = vld [vmem:[#allocation2 + $0x28] sm:$0xff] }
  0x48   :  { %1262 = vmatprep.subr.bf16.mxu0 %v1261_v27  ;;  %v1293_v10 = vpack.c.bf16 %v476_v8, %v475_v7  ;;  %v477_v11 = vld [vmem:[#allocation7 + $0x60] sm:$0xff]  ;;  %v478_v12 = vld [vmem:[#allocation7 + $0x68] sm:$0xff]  ;;  %v1655_v13 = vld [vmem:[#allocation2 + $0x30] sm:$0xff] }
  0x49   :  { %1342 = vmatpush1.bf16.msra.mxu1 %v1281_v57  ;;  %v1296_v14 = vpack.c.bf16 %v478_v12, %v477_v11  ;;  %v479_v15 = vld [vmem:[#allocation7 + $0x70] sm:$0xff]  ;;  %v480_v16 = vld [vmem:[#allocation7 + $0x78] sm:$0xff]  ;;  %v481_v19 = vld [vmem:[#allocation7 + $0x80] sm:$0xff] }
  0x4a   :  { %1327 = vmatprep.subr.bf16.mxu1 %v1533_v53  ;;  %v1661_v17 = vld [vmem:[#allocation2 + $0x38] sm:$0xff]  ;;  %v1299_v18 = vpack.c.bf16 %v480_v16, %v479_v15  ;;  %v482_v20 = vld [vmem:[#allocation7 + $0x88] sm:$0xff]  ;;  %v1667_v21 = vld [vmem:[#allocation2 + $0x40] sm:$0xff] }
  0x4b   :  { %1264 = vmatpush1.bf16.msra.mxu0 %v1263_v32  ;;  %v1302_v22 = vpack.c.bf16 %v482_v20, %v481_v19  ;;  %v483_v23 = vld [vmem:[#allocation7 + $0x90] sm:$0xff]  ;;  %v484_v24 = vld [vmem:[#allocation7 + $0x98] sm:$0xff]  ;;  %v1673_v25 = vld [vmem:[#allocation2 + $0x48] sm:$0xff] }
  0x4c   :  { %1266 = vmatprep.subr.bf16.mxu0 %v1265_v33  ;;  %v1305_v26 = vpack.c.bf16 %v484_v24, %v483_v23  ;;  %v485_v27 = vld [vmem:[#allocation7 + $0xa0] sm:$0xff]  ;;  %v486_v28 = vld [vmem:[#allocation7 + $0xa8] sm:$0xff]  ;;  %v1679_v29 = vld [vmem:[#allocation2 + $0x50] sm:$0xff] }
  0x4d   :  { %1343 = vmatpush1.bf16.msra.mxu1 %v1284_v61  ;;  %v1308_v30 = vpack.c.bf16 %v486_v28, %v485_v27  ;;  %v487_v31 = vld [vmem:[#allocation7 + $0xb0] sm:$0xff]  ;;  %v488_v32 = vld [vmem:[#allocation7 + $0xb8] sm:$0xff]  ;;  %v489_v35 = vld [vmem:[#allocation7 + $0xc0] sm:$0xff] }
  0x4e   :  { %1328 = vmatprep.subr.bf16.mxu1 %v1533_v53  ;;  %v1685_v33 = vld [vmem:[#allocation2 + $0x58] sm:$0xff]  ;;  %v1311_v34 = vpack.c.bf16 %v488_v32, %v487_v31  ;;  %v490_v36 = vld [vmem:[#allocation7 + $0xc8] sm:$0xff]  ;;  %v1691_v37 = vld [vmem:[#allocation2 + $0x60] sm:$0xff] }
  0x4f   :  { %1268 = vmatpush1.bf16.msra.mxu0 %v1267_v38  ;;  %v1314_v38 = vpack.c.bf16 %v490_v36, %v489_v35  ;;  %v492_v40 = vld [vmem:[#allocation7 + $0xd8] sm:$0xff]  ;;  %v1697_v41 = vld [vmem:[#allocation2 + $0x68] sm:$0xff]  ;;  %v1703_v43 = vld [vmem:[#allocation2 + $0x70] sm:$0xff] }
  0x50   :  { %1270 = vmatprep.subr.bf16.mxu0 %v1269_v39  ;;  %v491_v39 = vld [vmem:[#allocation7 + $0xd0] sm:$0xff]  ;;  %v1716_v46 = vld [vmem:[#allocation2 + $0x88] sm:$0xff]  ;;  %v1728_v49 = vld [vmem:[#allocation2 + $0xa0] sm:$0xff] }
  0x51   :  { %1344 = vmatpush1.bf16.msra.mxu1 %v1287_v2  ;;  %v1317_v42 = vpack.c.bf16 %v492_v40, %v491_v39  ;;  %v1720_v47 = vld [vmem:[#allocation2 + $0x90] sm:$0xff]  ;;  %v493_v50 = vld [vmem:[#allocation7 + $0xe0] sm:$0xff]  ;;  %v1732_v54 = vld [vmem:[#allocation2 + $0xa8] sm:$0xff] }
  0x52   :  { %1329 = vmatprep.subr.bf16.mxu1 %v1533_v53  ;;  %v496_v58 = vld [vmem:[#allocation7 + $0xf8] sm:$0xff]  ;;  %v1737_v59 = vld [vmem:[#allocation2 + $0xb0] sm:$0xff]  ;;  %v1746_v63 = vld [vmem:[#allocation2 + $0xc0] sm:$0xff] }
  0x53   :  { %1272 = vmatpush1.bf16.msra.mxu0 %v1271_v44  ;;  %v1708_v44 = vld [vmem:[#allocation2 + $0x78] sm:$0xff]  ;;  %v1762_v4 = vld [vmem:[#allocation2 + $0xe0] sm:$0xff]  ;;  %v1770_v7 = vld [vmem:[#allocation2 + $0xf0] sm:$0xff] }
  0x54   :  { %1274 = vmatprep.subr.bf16.mxu0 %v1273_v45  ;;  %v1712_v45 = vld [vmem:[#allocation2 + $0x80] sm:$0xff]  ;;  %v1742_v62 = vld [vmem:[#allocation2 + $0xb8] sm:$0xff] }
  0x55   :  { %1345 = vmatpush1.bf16.msra.mxu1 %v1290_v6  ;;  %v1758_v3 = vld [vmem:[#allocation2 + $0xd8] sm:$0xff] }
  0x56   :  { %1330 = vmatprep.subr.bf16.mxu1 %v1533_v53  ;;  %v1774_v8 = vld [vmem:[#allocation2 + $0xf8] sm:$0xff] }
  0x57   :  { %1276 = vmatpush1.bf16.msra.mxu0 %v1275_v48  ;;  %v1724_v48 = vld [vmem:[#allocation2 + $0x98] sm:$0xff] }
  0x58   :  { %1277 = vmatprep.subr.bf16.mxu0 %v1533_v53 }
  0x59   :  { %1346 = vmatpush1.bf16.msra.mxu1 %v1293_v10 }
  0x5a   :  { %209 = vmatmul.mubr.f32.vlgmr.msra.gmra.mrb[0].mxu0 %v1618_v51  ;;  %1331 = vmatprep.subr.bf16.mxu1 %v1533_v53 }
  0x5b   :  { %214 = vmatprep.mubr.f32.mxu0 %v1532_v0  ;;  %1279 = vmatpush1.bf16.msra.mxu0 %v1278_v52  ;;  %v494_v52 = vld [vmem:[#allocation7 + $0xe8] sm:$0xff] }
  0x5c   :  { %1280 = vmatprep.subr.bf16.mxu0 %v1533_v53  ;;  %v1320_v55 = vpack.c.bf16 %v494_v52, %v493_v50 }
  0x5d   :  { %1347 = vmatpush1.bf16.msra.mxu1 %v1296_v14 }
  0x5e   :  { %215 = vmatmul.mubr.f32.gmra.mrb[2].mxu0 %v1625_v56  ;;  %1332 = vmatprep.subr.bf16.mxu1 %v1533_v53 }
  0x5f   :  { %220 = vmatprep.mubr.f32.mxu0 %v1532_v0  ;;  %1282 = vmatpush1.bf16.msra.mxu0 %v1281_v57  ;;  %v495_v57 = vld [vmem:[#allocation7 + $0xf0] sm:$0xff] }
  0x60   :  { %1283 = vmatprep.subr.bf16.mxu0 %v1533_v53 }
  0x61   :  { %1348 = vmatpush1.bf16.msra.mxu1 %v1299_v18 }
  0x62   :  { %221 = vmatmul.mubr.f32.gmra.mrb[4].mxu0 %v1631_v60  ;;  %1333 = vmatprep.subr.bf16.mxu1 %v1533_v53 }
  0x63   :  { %226 = vmatprep.mubr.f32.mxu0 %v1532_v0  ;;  %1285 = vmatpush1.bf16.msra.mxu0 %v1284_v61  ;;  %v1323_v61 = vpack.c.bf16 %v496_v58, %v495_v57 }
  0x64   :  { %1286 = vmatprep.subr.bf16.mxu0 %v1533_v53 }
  0x65   :  { %1349 = vmatpush1.bf16.msra.mxu1 %v1302_v22 }
  0x66   :  { %227 = vmatmul.mubr.f32.gmra.mrb[6].mxu0 %v1637_v1  ;;  %1334 = vmatprep.subr.bf16.mxu1 %v1533_v53 }
  0x67   :  { %232 = vmatprep.mubr.f32.mxu0 %v1532_v0  ;;  %1288 = vmatpush1.bf16.msra.mxu0 %v1287_v2  ;;  %v1750_v2 = vld [vmem:[#allocation2 + $0xc8] sm:$0xff] }
  0x68   :  { %1289 = vmatprep.subr.bf16.mxu0 %v1533_v53 }
  0x69   :  { %1350 = vmatpush1.bf16.msra.mxu1 %v1305_v26 }
  0x6a   :  { %233 = vmatmul.mubr.f32.gmra.mrb[8].mxu0 %v1643_v5  ;;  %1335 = vmatprep.subr.bf16.mxu1 %v1533_v53 }
  0x6b   :  { %238 = vmatprep.mubr.f32.mxu0 %v1532_v0  ;;  %1291 = vmatpush1.bf16.msra.mxu0 %v1290_v6  ;;  %v1766_v6 = vld [vmem:[#allocation2 + $0xe8] sm:$0xff] }
  0x6c   :  { %1292 = vmatprep.subr.bf16.mxu0 %v1533_v53 }
  0x6d   :  { %1351 = vmatpush1.bf16.msra.mxu1 %v1308_v30 }
  0x6e   :  { %239 = vmatmul.mubr.f32.gmra.mrb[10].mxu0 %v1649_v9  ;;  %1336 = vmatprep.subr.bf16.mxu1 %v1533_v53 }
  0x6f   :  { %244 = vmatprep.mubr.f32.mxu0 %v1532_v0  ;;  %1294 = vmatpush1.bf16.msra.mxu0 %v1293_v10  ;;  %v134_v10 = vlaneseq }
  0x70   :  { %1295 = vmatprep.subr.bf16.mxu0 %v1533_v53 }
  0x71   :  { %1352 = vmatpush1.bf16.msra.mxu1 %v1311_v34  ;;  %v135_v11 = vshrl.u32 %v134_v10, 7 }
  0x72   :  { %245 = vmatmul.mubr.f32.gmra.mrb[12].mxu0 %v1655_v13  ;;  %1337 = vmatprep.subr.bf16.mxu1 %v1533_v53 }
  0x73   :  { %250 = vmatprep.mubr.f32.mxu0 %v1532_v0  ;;  %1297 = vmatpush1.bf16.msra.mxu0 %v1296_v14  ;;  %v136_v12 = vsub.s32 0, %v135_v11  ;;  %v132_v14 = vld [vmem:[%s2296_s2] sm:$0x3]  ;;  %v140_v15 = vsub.s32 1, %v135_v11 }
  0x74   :  { %1298 = vmatprep.subr.bf16.mxu0 %v1533_v53 }
  0x75   :  { %1353 = vmatpush1.bf16.msra.mxu1 %v1314_v38  ;;  %v1780_v16 = vrot.slane %v132_v14, %v136_v12 }
  0x76   :  { %251 = vmatmul.mubr.f32.gmra.mrb[14].mxu0 %v1661_v17  ;;  %1338 = vmatprep.subr.bf16.mxu1 %v1533_v53 }
  0x77   :  { %256 = vmatprep.mubr.f32.mxu0 %v1532_v0  ;;  %1300 = vmatpush1.bf16.msra.mxu0 %v1299_v18  ;;  %v1782_v18 = vrot.slane %v132_v14, %v140_v15 }
  0x78   :  { %1301 = vmatprep.subr.bf16.mxu0 %v1533_v53 }
  0x79   :  { %1354 = vmatpush1.bf16.msra.mxu1 %v1317_v42 }
  0x7a   :  { %257 = vmatmul.mubr.f32.gmra.mrb[16].mxu0 %v1667_v21  ;;  %1339 = vmatprep.subr.bf16.mxu1 %v1533_v53 }
  0x7b   :  { %262 = vmatprep.mubr.f32.mxu0 %v1532_v0  ;;  %1303 = vmatpush1.bf16.msra.mxu0 %v1302_v22 }
  0x7c   :  { %1304 = vmatprep.subr.bf16.mxu0 %v1533_v53 }
  0x7d   :  { %1355 = vmatpush1.bf16.msra.mxu1 %v1320_v55 }
  0x7e   :  { %263 = vmatmul.mubr.f32.gmra.mrb[18].mxu0 %v1673_v25  ;;  %1340 = vmatprep.subr.bf16.mxu1 %v1533_v53 }
  0x7f   :  { %268 = vmatprep.mubr.f32.mxu0 %v1532_v0  ;;  %1306 = vmatpush1.bf16.msra.mxu0 %v1305_v26 }
  0x80   :  { %1307 = vmatprep.subr.bf16.mxu0 %v1533_v53 }
  0x81   :  { %1356 = vmatpush1.bf16.msra.mxu1 %v1323_v61 }
  0x82   :  { %269 = vmatmul.mubr.f32.gmra.mrb[20].mxu0 %v1679_v29 }
  0x83   :  { %274 = vmatprep.mubr.f32.mxu0 %v1532_v0  ;;  %1309 = vmatpush1.bf16.msra.mxu0 %v1308_v30 }
  0x84   :  { %1310 = vmatprep.subr.bf16.mxu0 %v1533_v53 }
  0x86   :  { %275 = vmatmul.mubr.f32.gmra.mrb[22].mxu0 %v1685_v33 }
  0x87   :  { %280 = vmatprep.mubr.f32.mxu0 %v1532_v0  ;;  %1312 = vmatpush1.bf16.msra.mxu0 %v1311_v34 }
  0x88   :  { %1313 = vmatprep.subr.bf16.mxu0 %v1533_v53 }
  0x8a   :  { %281 = vmatmul.mubr.f32.gmra.mrb[24].mxu0 %v1691_v37 }
  0x8b   :  { %286 = vmatprep.mubr.f32.mxu0 %v1532_v0  ;;  %1315 = vmatpush1.bf16.msra.mxu0 %v1314_v38 }
  0x8c   :  { %1316 = vmatprep.subr.bf16.mxu0 %v1533_v53 }
  0x8e   :  { %287 = vmatmul.mubr.f32.gmra.mrb[26].mxu0 %v1697_v41 }
  0x8f   :  { %292 = vmatprep.mubr.f32.mxu0 %v1532_v0  ;;  %1318 = vmatpush1.bf16.msra.mxu0 %v1317_v42 }
  0x90   :  { %1319 = vmatprep.subr.bf16.mxu0 %v1533_v53 }
  0x92   :  { %293 = vmatmul.mubr.f32.gmra.mrb[28].mxu0 %v1703_v43 }
  0x93   :  { %298 = vmatprep.mubr.f32.mxu0 %v1532_v0  ;;  %1321 = vmatpush1.bf16.msra.mxu0 %v1320_v55 }
  0x94   :  { %1322 = vmatprep.subr.bf16.mxu0 %v1533_v53  ;;  %v1754_v53 = vld [vmem:[#allocation2 + $0xd0] sm:$0xff] }
  0x96   :  { %299 = vmatmul.mubr.f32.gmra.mrb[30].mxu0 %v1708_v44 }
  0x97   :  { %304 = vmatprep.mubr.f32.mxu0 %v1532_v0  ;;  %1324 = vmatpush1.bf16.msra.mxu0 %v1323_v61 }
  0x9a   :  { %305 = vmatmul.mubr.f32.gmra.mrb[32].mxu0 %v1712_v45 }
  0x9b   :  { %310 = vmatprep.mubr.f32.mxu0 %v1532_v0 }
  0x9e   :  { %311 = vmatmul.mubr.f32.gmra.mrb[34].mxu0 %v1716_v46 }
  0x9f   :  { %316 = vmatprep.mubr.f32.mxu0 %v1532_v0 }
  0xa2   :  { %317 = vmatmul.mubr.f32.gmra.mrb[36].mxu0 %v1720_v47 }
  0xa3   :  { %322 = vmatprep.mubr.f32.mxu0 %v1532_v0 }
  0xa6   :  { %323 = vmatmul.mubr.f32.gmra.mrb[38].mxu0 %v1724_v48 }
  0xa7   :  { %328 = vmatprep.mubr.f32.mxu0 %v1532_v0 }
  0xaa   :  { %329 = vmatmul.mubr.f32.gmra.mrb[40].mxu0 %v1728_v49 }
  0xab   :  { %334 = vmatprep.mubr.f32.mxu0 %v1532_v0 }
  0xae   :  { %335 = vmatmul.mubr.f32.gmra.mrb[42].mxu0 %v1732_v54 }
  0xaf   :  { %340 = vmatprep.mubr.f32.mxu0 %v1532_v0 }
  0xb2   :  { %341 = vmatmul.mubr.f32.gmra.mrb[44].mxu0 %v1737_v59 }
  0xb3   :  { %346 = vmatprep.mubr.f32.mxu0 %v1532_v0 }
  0xb6   :  { %347 = vmatmul.mubr.f32.gmra.mrb[46].mxu0 %v1742_v62 }
  0xb7   :  { %352 = vmatprep.mubr.f32.mxu0 %v1532_v0 }
  0xba   :  { %353 = vmatmul.mubr.f32.gmra.mrb[48].mxu0 %v1746_v63 }
  0xbb   :  { %358 = vmatprep.mubr.f32.mxu0 %v1532_v0 }
  0xbe   :  { %359 = vmatmul.mubr.f32.gmra.mrb[50].mxu0 %v1750_v2 }
  0xbf   :  { %364 = vmatprep.mubr.f32.mxu0 %v1532_v0 }
  0xc2   :  { %365 = vmatmul.mubr.f32.gmra.mrb[52].mxu0 %v1754_v53 }
  0xc3   :  { %370 = vmatprep.mubr.f32.mxu0 %v1532_v0 }
  0xc6   :  { %371 = vmatmul.mubr.f32.gmra.mrb[54].mxu0 %v1758_v3 }
  0xc7   :  { %376 = vmatprep.mubr.f32.mxu0 %v1532_v0 }
  0xca   :  { %377 = vmatmul.mubr.f32.gmra.mrb[56].mxu0 %v1762_v4 }
  0xcb   :  { %382 = vmatprep.mubr.f32.mxu0 %v1532_v0 }
  0xce   :  { %383 = vmatmul.mubr.f32.gmra.mrb[58].mxu0 %v1766_v6 }
  0xcf   :  { %388 = vmatprep.mubr.f32.mxu0 %v1532_v0 }
  0xd2   :  { %389 = vmatmul.mubr.f32.gmra.mrb[60].mxu0 %v1770_v7 }
  0xd3   :  { %394 = vmatprep.mubr.f32.mxu0 %v1532_v0 }
  0xd6   :  { %395 = vmatmul.mubr.f32.gmra.mrb[62].mxu0 %v1774_v8 }
 0x12d   :  { %v210_v19 = vpop.f32.mrb[0].mxu0 }
 0x12e   :  { %v211_v20 = vadd.f32 %v210_v19, %v1780_v16  ;;  %v212_v0 = vpop.f32.mrb[1].mxu0 }
 0x12f   :  { %v213_v22 = vadd.f32 %v212_v0, %v1782_v18 }
 0x130   :  { %v401_v26 = vmax.f32 %v211_v20, 0.0 }
 0x131   :  { %v402_v23 = vmax.f32 %v213_v22, 0.0  ;;  %v216_v24 = vpop.f32.mrb[2].mxu0 }
 0x132   :  { %v217_v27 = vadd.f32 %v216_v24, %v1780_v16  ;;  %v218_v28 = vpop.f32.mrb[3].mxu0 }
 0x133   :  { %v219_v30 = vadd.f32 %v218_v28, %v1782_v18  ;;  %568 = vmatprep.mubr.f32.mxu0 %v402_v23 }
 0x134   :  { %569 = vmatmul.mubr.f32.vlgmr.msra.gmra.mrb[64].mxu0 %v401_v26  ;;  %v403_v34 = vmax.f32 %v217_v27, 0.0 }
 0x135   :  { %v404_v31 = vmax.f32 %v219_v30, 0.0  ;;  %v222_v32 = vpop.f32.mrb[4].mxu0 }
 0x136   :  { %v223_v35 = vadd.f32 %v222_v32, %v1780_v16  ;;  %v224_v36 = vpop.f32.mrb[5].mxu0 }
 0x137   :  { %v225_v38 = vadd.f32 %v224_v36, %v1782_v18  ;;  %573 = vmatprep.mubr.f32.mxu0 %v404_v31 }
 0x138   :  { %574 = vmatmul.mubr.f32.gmra.mrb[66].mxu0 %v403_v34  ;;  %v405_v42 = vmax.f32 %v223_v35, 0.0 }
 0x139   :  { %v406_v39 = vmax.f32 %v225_v38, 0.0  ;;  %v228_v40 = vpop.f32.mrb[6].mxu0 }
 0x13a   :  { %v229_v50 = vadd.f32 %v228_v40, %v1780_v16  ;;  %v230_v52 = vpop.f32.mrb[7].mxu0 }
 0x13b   :  { %v231_v55 = vadd.f32 %v230_v52, %v1782_v18  ;;  %578 = vmatprep.mubr.f32.mxu0 %v406_v39 }
 0x13c   :  { %579 = vmatmul.mubr.f32.gmra.mrb[68].mxu0 %v405_v42  ;;  %v407_v61 = vmax.f32 %v229_v50, 0.0 }
 0x13d   :  { %v408_v57 = vmax.f32 %v231_v55, 0.0  ;;  %v234_v58 = vpop.f32.mrb[8].mxu0 }
 0x13e   :  { %v235_v10 = vadd.f32 %v234_v58, %v1780_v16  ;;  %v236_v11 = vpop.f32.mrb[9].mxu0 }
 0x13f   :  { %583 = vmatprep.mubr.f32.mxu0 %v408_v57  ;;  %v237_v12 = vadd.f32 %v236_v11, %v1782_v18 }
 0x140   :  { %584 = vmatmul.mubr.f32.gmra.mrb[70].mxu0 %v407_v61  ;;  %v409_v19 = vmax.f32 %v235_v10, 0.0 }
 0x141   :  { %v240_v14 = vpop.f32.mrb[10].mxu0  ;;  %v410_v15 = vmax.f32 %v237_v12, 0.0 }
 0x142   :  { %v241_v20 = vadd.f32 %v240_v14, %v1780_v16  ;;  %v242_v0 = vpop.f32.mrb[11].mxu0 }
 0x143   :  { %v243_v22 = vadd.f32 %v242_v0, %v1782_v18  ;;  %588 = vmatprep.mubr.f32.mxu1 %v410_v15 }
 0x144   :  { %589 = vmatmul.mubr.f32.vlgmr.msra.gmra.mrb[0].mxu1 %v409_v19  ;;  %v411_v26 = vmax.f32 %v241_v20, 0.0 }
 0x145   :  { %v412_v23 = vmax.f32 %v243_v22, 0.0  ;;  %v246_v24 = vpop.f32.mrb[12].mxu0 }
 0x146   :  { %v247_v27 = vadd.f32 %v246_v24, %v1780_v16  ;;  %v248_v28 = vpop.f32.mrb[13].mxu0 }
 0x147   :  { %v249_v30 = vadd.f32 %v248_v28, %v1782_v18  ;;  %593 = vmatprep.mubr.f32.mxu1 %v412_v23 }
 0x148   :  { %594 = vmatmul.mubr.f32.gmra.mrb[2].mxu1 %v411_v26  ;;  %v413_v34 = vmax.f32 %v247_v27, 0.0 }
 0x149   :  { %v414_v31 = vmax.f32 %v249_v30, 0.0  ;;  %v252_v32 = vpop.f32.mrb[14].mxu0 }
 0x14a   :  { %v253_v35 = vadd.f32 %v252_v32, %v1780_v16  ;;  %v254_v36 = vpop.f32.mrb[15].mxu0 }
 0x14b   :  { %v255_v38 = vadd.f32 %v254_v36, %v1782_v18  ;;  %598 = vmatprep.mubr.f32.mxu1 %v414_v31 }
 0x14c   :  { %599 = vmatmul.mubr.f32.gmra.mrb[4].mxu1 %v413_v34  ;;  %v415_v42 = vmax.f32 %v253_v35, 0.0 }
 0x14d   :  { %v416_v39 = vmax.f32 %v255_v38, 0.0  ;;  %v258_v40 = vpop.f32.mrb[16].mxu0 }
 0x14e   :  { %v259_v50 = vadd.f32 %v258_v40, %v1780_v16  ;;  %v260_v52 = vpop.f32.mrb[17].mxu0 }
 0x14f   :  { %v261_v55 = vadd.f32 %v260_v52, %v1782_v18  ;;  %603 = vmatprep.mubr.f32.mxu1 %v416_v39 }
 0x150   :  { %604 = vmatmul.mubr.f32.gmra.mrb[6].mxu1 %v415_v42  ;;  %v417_v61 = vmax.f32 %v259_v50, 0.0 }
 0x151   :  { %v418_v57 = vmax.f32 %v261_v55, 0.0  ;;  %v264_v58 = vpop.f32.mrb[18].mxu0 }
 0x152   :  { %v265_v10 = vadd.f32 %v264_v58, %v1780_v16  ;;  %v266_v11 = vpop.f32.mrb[19].mxu0 }
 0x153   :  { %v267_v12 = vadd.f32 %v266_v11, %v1782_v18  ;;  %608 = vmatprep.mubr.f32.mxu1 %v418_v57 }
 0x154   :  { %609 = vmatmul.mubr.f32.gmra.mrb[8].mxu1 %v417_v61  ;;  %v419_v19 = vmax.f32 %v265_v10, 0.0 }
 0x155   :  { %v420_v14 = vmax.f32 %v267_v12, 0.0  ;;  %v270_v15 = vpop.f32.mrb[20].mxu0 }
 0x156   :  { %v271_v20 = vadd.f32 %v270_v15, %v1780_v16  ;;  %v272_v0 = vpop.f32.mrb[21].mxu0 }
 0x157   :  { %v273_v22 = vadd.f32 %v272_v0, %v1782_v18  ;;  %613 = vmatprep.mubr.f32.mxu1 %v420_v14 }
 0x158   :  { %614 = vmatmul.mubr.f32.gmra.mrb[10].mxu1 %v419_v19  ;;  %v421_v26 = vmax.f32 %v271_v20, 0.0 }
 0x159   :  { %v422_v23 = vmax.f32 %v273_v22, 0.0  ;;  %v276_v24 = vpop.f32.mrb[22].mxu0 }
 0x15a   :  { %v277_v27 = vadd.f32 %v276_v24, %v1780_v16  ;;  %v278_v28 = vpop.f32.mrb[23].mxu0 }
 0x15b   :  { %v279_v30 = vadd.f32 %v278_v28, %v1782_v18  ;;  %618 = vmatprep.mubr.f32.mxu1 %v422_v23 }
 0x15c   :  { %619 = vmatmul.mubr.f32.gmra.mrb[12].mxu1 %v421_v26  ;;  %v423_v34 = vmax.f32 %v277_v27, 0.0 }
 0x15d   :  { %v424_v31 = vmax.f32 %v279_v30, 0.0  ;;  %v282_v32 = vpop.f32.mrb[24].mxu0 }
 0x15e   :  { %v283_v35 = vadd.f32 %v282_v32, %v1780_v16  ;;  %v284_v36 = vpop.f32.mrb[25].mxu0 }
 0x15f   :  { %v285_v38 = vadd.f32 %v284_v36, %v1782_v18  ;;  %623 = vmatprep.mubr.f32.mxu1 %v424_v31 }
 0x160   :  { %624 = vmatmul.mubr.f32.gmra.mrb[14].mxu1 %v423_v34  ;;  %v425_v42 = vmax.f32 %v283_v35, 0.0 }
 0x161   :  { %v426_v39 = vmax.f32 %v285_v38, 0.0  ;;  %v288_v40 = vpop.f32.mrb[26].mxu0 }
 0x162   :  { %v289_v50 = vadd.f32 %v288_v40, %v1780_v16  ;;  %v290_v52 = vpop.f32.mrb[27].mxu0 }
 0x163   :  { %v291_v55 = vadd.f32 %v290_v52, %v1782_v18  ;;  %628 = vmatprep.mubr.f32.mxu1 %v426_v39 }
 0x164   :  { %629 = vmatmul.mubr.f32.gmra.mrb[16].mxu1 %v425_v42  ;;  %v427_v61 = vmax.f32 %v289_v50, 0.0 }
 0x165   :  { %v428_v57 = vmax.f32 %v291_v55, 0.0  ;;  %v294_v58 = vpop.f32.mrb[28].mxu0 }
 0x166   :  { %v295_v10 = vadd.f32 %v294_v58, %v1780_v16  ;;  %v296_v11 = vpop.f32.mrb[29].mxu0 }
 0x167   :  { %v297_v12 = vadd.f32 %v296_v11, %v1782_v18  ;;  %633 = vmatprep.mubr.f32.mxu1 %v428_v57 }
 0x168   :  { %634 = vmatmul.mubr.f32.gmra.mrb[18].mxu1 %v427_v61  ;;  %v429_v19 = vmax.f32 %v295_v10, 0.0 }
 0x169   :  { %v430_v14 = vmax.f32 %v297_v12, 0.0  ;;  %v300_v15 = vpop.f32.mrb[30].mxu0 }
 0x16a   :  { %v301_v20 = vadd.f32 %v300_v15, %v1780_v16  ;;  %v302_v0 = vpop.f32.mrb[31].mxu0 }
 0x16b   :  { %v303_v22 = vadd.f32 %v302_v0, %v1782_v18  ;;  %638 = vmatprep.mubr.f32.mxu1 %v430_v14 }
 0x16c   :  { %639 = vmatmul.mubr.f32.gmra.mrb[20].mxu1 %v429_v19  ;;  %v431_v26 = vmax.f32 %v301_v20, 0.0 }
 0x16d   :  { %v432_v23 = vmax.f32 %v303_v22, 0.0  ;;  %v306_v24 = vpop.f32.mrb[32].mxu0 }
 0x16e   :  { %v307_v27 = vadd.f32 %v306_v24, %v1780_v16  ;;  %v308_v28 = vpop.f32.mrb[33].mxu0 }
 0x16f   :  { %v309_v30 = vadd.f32 %v308_v28, %v1782_v18  ;;  %643 = vmatprep.mubr.f32.mxu1 %v432_v23 }
 0x170   :  { %644 = vmatmul.mubr.f32.gmra.mrb[22].mxu1 %v431_v26  ;;  %v433_v34 = vmax.f32 %v307_v27, 0.0 }
 0x171   :  { %v434_v31 = vmax.f32 %v309_v30, 0.0  ;;  %v312_v32 = vpop.f32.mrb[34].mxu0 }
 0x172   :  { %v313_v35 = vadd.f32 %v312_v32, %v1780_v16  ;;  %v314_v36 = vpop.f32.mrb[35].mxu0 }
 0x173   :  { %v315_v38 = vadd.f32 %v314_v36, %v1782_v18  ;;  %648 = vmatprep.mubr.f32.mxu1 %v434_v31 }
 0x174   :  { %649 = vmatmul.mubr.f32.gmra.mrb[24].mxu1 %v433_v34  ;;  %v435_v42 = vmax.f32 %v313_v35, 0.0 }
 0x175   :  { %v436_v39 = vmax.f32 %v315_v38, 0.0  ;;  %v318_v40 = vpop.f32.mrb[36].mxu0 }
 0x176   :  { %v319_v50 = vadd.f32 %v318_v40, %v1780_v16  ;;  %v320_v52 = vpop.f32.mrb[37].mxu0 }
 0x177   :  { %v321_v55 = vadd.f32 %v320_v52, %v1782_v18  ;;  %653 = vmatprep.mubr.f32.mxu1 %v436_v39 }
 0x178   :  { %654 = vmatmul.mubr.f32.gmra.mrb[26].mxu1 %v435_v42  ;;  %v437_v61 = vmax.f32 %v319_v50, 0.0 }
 0x179   :  { %v438_v57 = vmax.f32 %v321_v55, 0.0  ;;  %v324_v58 = vpop.f32.mrb[38].mxu0 }
 0x17a   :  { %v325_v10 = vadd.f32 %v324_v58, %v1780_v16  ;;  %v326_v11 = vpop.f32.mrb[39].mxu0 }
 0x17b   :  { %v327_v12 = vadd.f32 %v326_v11, %v1782_v18  ;;  %658 = vmatprep.mubr.f32.mxu1 %v438_v57 }
 0x17c   :  { %659 = vmatmul.mubr.f32.gmra.mrb[28].mxu1 %v437_v61  ;;  %v439_v19 = vmax.f32 %v325_v10, 0.0 }
 0x17d   :  { %v440_v14 = vmax.f32 %v327_v12, 0.0  ;;  %v330_v15 = vpop.f32.mrb[40].mxu0 }
 0x17e   :  { %v331_v20 = vadd.f32 %v330_v15, %v1780_v16  ;;  %v332_v0 = vpop.f32.mrb[41].mxu0 }
 0x17f   :  { %v333_v22 = vadd.f32 %v332_v0, %v1782_v18  ;;  %663 = vmatprep.mubr.f32.mxu1 %v440_v14 }
 0x180   :  { %664 = vmatmul.mubr.f32.gmra.mrb[30].mxu1 %v439_v19  ;;  %v441_v26 = vmax.f32 %v331_v20, 0.0 }
 0x181   :  { %v442_v23 = vmax.f32 %v333_v22, 0.0  ;;  %v336_v24 = vpop.f32.mrb[42].mxu0 }
 0x182   :  { %v337_v27 = vadd.f32 %v336_v24, %v1780_v16  ;;  %v338_v28 = vpop.f32.mrb[43].mxu0 }
 0x183   :  { %v339_v30 = vadd.f32 %v338_v28, %v1782_v18  ;;  %668 = vmatprep.mubr.f32.mxu1 %v442_v23 }
 0x184   :  { %669 = vmatmul.mubr.f32.gmra.mrb[32].mxu1 %v441_v26  ;;  %v443_v34 = vmax.f32 %v337_v27, 0.0 }
 0x185   :  { %v444_v31 = vmax.f32 %v339_v30, 0.0  ;;  %v342_v32 = vpop.f32.mrb[44].mxu0 }
 0x186   :  { %v343_v35 = vadd.f32 %v342_v32, %v1780_v16  ;;  %v344_v36 = vpop.f32.mrb[45].mxu0 }
 0x187   :  { %v345_v38 = vadd.f32 %v344_v36, %v1782_v18  ;;  %673 = vmatprep.mubr.f32.mxu1 %v444_v31 }
 0x188   :  { %674 = vmatmul.mubr.f32.gmra.mrb[34].mxu1 %v443_v34  ;;  %v445_v42 = vmax.f32 %v343_v35, 0.0 }
 0x189   :  { %v446_v39 = vmax.f32 %v345_v38, 0.0  ;;  %v348_v40 = vpop.f32.mrb[46].mxu0 }
 0x18a   :  { %v349_v50 = vadd.f32 %v348_v40, %v1780_v16  ;;  %v350_v52 = vpop.f32.mrb[47].mxu0 }
 0x18b   :  { %v351_v55 = vadd.f32 %v350_v52, %v1782_v18  ;;  %678 = vmatprep.mubr.f32.mxu1 %v446_v39 }
 0x18c   :  { %679 = vmatmul.mubr.f32.gmra.mrb[36].mxu1 %v445_v42  ;;  %v447_v61 = vmax.f32 %v349_v50, 0.0 }
 0x18d   :  { %v448_v57 = vmax.f32 %v351_v55, 0.0  ;;  %v354_v58 = vpop.f32.mrb[48].mxu0 }
 0x18e   :  { %v355_v10 = vadd.f32 %v354_v58, %v1780_v16  ;;  %v356_v11 = vpop.f32.mrb[49].mxu0 }
 0x18f   :  { %v357_v12 = vadd.f32 %v356_v11, %v1782_v18  ;;  %683 = vmatprep.mubr.f32.mxu1 %v448_v57 }
 0x190   :  { %684 = vmatmul.mubr.f32.gmra.mrb[38].mxu1 %v447_v61  ;;  %v449_v19 = vmax.f32 %v355_v10, 0.0 }
 0x191   :  { %v450_v14 = vmax.f32 %v357_v12, 0.0  ;;  %v360_v15 = vpop.f32.mrb[50].mxu0 }
 0x192   :  { %v361_v20 = vadd.f32 %v360_v15, %v1780_v16  ;;  %v362_v0 = vpop.f32.mrb[51].mxu0 }
 0x193   :  { %v363_v22 = vadd.f32 %v362_v0, %v1782_v18  ;;  %688 = vmatprep.mubr.f32.mxu1 %v450_v14 }
 0x194   :  { %689 = vmatmul.mubr.f32.gmra.mrb[40].mxu1 %v449_v19  ;;  %v451_v26 = vmax.f32 %v361_v20, 0.0 }
 0x195   :  { %v452_v23 = vmax.f32 %v363_v22, 0.0  ;;  %v366_v24 = vpop.f32.mrb[52].mxu0 }
 0x196   :  { %v367_v27 = vadd.f32 %v366_v24, %v1780_v16  ;;  %v368_v28 = vpop.f32.mrb[53].mxu0 }
 0x197   :  { %v369_v30 = vadd.f32 %v368_v28, %v1782_v18  ;;  %693 = vmatprep.mubr.f32.mxu1 %v452_v23 }
 0x198   :  { %694 = vmatmul.mubr.f32.gmra.mrb[42].mxu1 %v451_v26  ;;  %v453_v34 = vmax.f32 %v367_v27, 0.0 }
 0x199   :  { %v454_v31 = vmax.f32 %v369_v30, 0.0  ;;  %v372_v32 = vpop.f32.mrb[54].mxu0 }
 0x19a   :  { %v373_v35 = vadd.f32 %v372_v32, %v1780_v16  ;;  %v374_v36 = vpop.f32.mrb[55].mxu0 }
 0x19b   :  { %v375_v38 = vadd.f32 %v374_v36, %v1782_v18  ;;  %698 = vmatprep.mubr.f32.mxu1 %v454_v31 }
 0x19c   :  { %699 = vmatmul.mubr.f32.gmra.mrb[44].mxu1 %v453_v34  ;;  %v455_v42 = vmax.f32 %v373_v35, 0.0  ;;  %v1851_v34 = vld [vmem:[%s2298_s4] ss:$0 sm:$0xff] }
 0x19d   :  { %v456_v39 = vmax.f32 %v375_v38, 0.0  ;;  %v378_v40 = vpop.f32.mrb[56].mxu0 }
 0x19e   :  { %v379_v50 = vadd.f32 %v378_v40, %v1780_v16  ;;  %v380_v52 = vpop.f32.mrb[57].mxu0 }
 0x19f   :  { %v381_v55 = vadd.f32 %v380_v52, %v1782_v18  ;;  %703 = vmatprep.mubr.f32.mxu1 %v456_v39 }
 0x1a0   :  { %704 = vmatmul.mubr.f32.gmra.mrb[46].mxu1 %v455_v42  ;;  %v457_v61 = vmax.f32 %v379_v50, 0.0 }
 0x1a1   :  { %v458_v57 = vmax.f32 %v381_v55, 0.0  ;;  %v384_v58 = vpop.f32.mrb[58].mxu0 }
 0x1a2   :  { %v385_v10 = vadd.f32 %v384_v58, %v1780_v16  ;;  %v386_v11 = vpop.f32.mrb[59].mxu0 }
 0x1a3   :  { %v387_v12 = vadd.f32 %v386_v11, %v1782_v18  ;;  %708 = vmatprep.mubr.f32.mxu1 %v458_v57 }
 0x1a4   :  { %709 = vmatmul.mubr.f32.gmra.mrb[48].mxu1 %v457_v61  ;;  %v459_v19 = vmax.f32 %v385_v10, 0.0 }
 0x1a5   :  { %v460_v14 = vmax.f32 %v387_v12, 0.0  ;;  %v390_v15 = vpop.f32.mrb[60].mxu0 }
 0x1a6   :  { %v391_v20 = vadd.f32 %v390_v15, %v1780_v16  ;;  %v392_v0 = vpop.f32.mrb[61].mxu0 }
 0x1a7   :  { %v393_v22 = vadd.f32 %v392_v0, %v1782_v18  ;;  %713 = vmatprep.mubr.f32.mxu1 %v460_v14 }
 0x1a8   :  { %714 = vmatmul.mubr.f32.gmra.mrb[50].mxu1 %v459_v19  ;;  %v461_v26 = vmax.f32 %v391_v20, 0.0 }
 0x1a9   :  { %v462_v23 = vmax.f32 %v393_v22, 0.0  ;;  %v396_v24 = vpop.f32.mrb[62].mxu0 }
 0x1aa   :  { %v397_v27 = vadd.f32 %v396_v24, %v1780_v16  ;;  %v398_v28 = vpop.f32.mrb[63].mxu0 }
 0x1ab   :  { %v399_v30 = vadd.f32 %v398_v28, %v1782_v18  ;;  %718 = vmatprep.mubr.f32.mxu1 %v462_v23 }
 0x1ac   :  { %719 = vmatmul.mubr.f32.gmra.mrb[52].mxu1 %v461_v26  ;;  %v463_v32 = vmax.f32 %v397_v27, 0.0 }
 0x1ad   :  { %v464_v31 = vmax.f32 %v399_v30, 0.0 }
 0x1af   :  { %723 = vmatprep.mubr.f32.mxu1 %v464_v31 }
 0x1b0   :  { %724 = vmatmul.mubr.f32.gmra.mrb[54].mxu1 %v463_v32 }
 0x207   :  { %v570_v35 = vpop.f32.mrb[64].mxu0 }
 0x208   :  { %v571_v36 = vadd.f32 %v1851_v34, %v570_v35  ;;  %v572_v38 = vpop.f32.mrb[65].mxu0 }
 0x20a   :  { %v1855_v16 = vadd.f32 %v571_v36, %v1618_v51 }
 0x20b   :  { %v575_v39 = vpop.f32.mrb[66].mxu0 }
 0x20c   :  { %v576_v18 = vadd.f32 %v1851_v34, %v575_v39  ;;  %v577_v40 = vpop.f32.mrb[67].mxu0  ;;  %763 = vadd.xlane.f32.xlu0 %v1855_v16 }
 0x20e   :  { %v1860_v42 = vadd.f32 %v576_v18, %v1625_v56 }
 0x20f   :  { %v580_v50 = vpop.f32.mrb[68].mxu0 }
 0x210   :  { %v581_v52 = vadd.f32 %v1851_v34, %v580_v50  ;;  %v582_v55 = vpop.f32.mrb[69].mxu0  ;;  %765 = vadd.xlane.f32.xlu0 %v1860_v42 }
 0x212   :  { %v1865_v57 = vadd.f32 %v581_v52, %v1631_v60 }
 0x213   :  { %v585_v51 = vpop.f32.mrb[70].mxu0 }
 0x214   :  { %v586_v58 = vadd.f32 %v1851_v34, %v585_v51  ;;  %v587_v61 = vpop.f32.mrb[71].mxu0  ;;  %767 = vadd.xlane.f32.xlu1 %v1865_v57 }
 0x216   :  { %v1870_v10 = vadd.f32 %v586_v58, %v1637_v1 }
 0x217   :  { %v590_v56 = vpop.f32.mrb[0].mxu1 }
 0x218   :  { %v591_v11 = vadd.f32 %v1851_v34, %v590_v56  ;;  %v592_v12 = vpop.f32.mrb[1].mxu1  ;;  %769 = vadd.xlane.f32.xlu1 %v1870_v10 }
 0x21a   :  { %v1875_v14 = vadd.f32 %v591_v11, %v1643_v5 }
 0x21b   :  { %v595_v60 = vpop.f32.mrb[2].mxu1 }
 0x21c   :  { %v596_v15 = vadd.f32 %v1851_v34, %v595_v60  ;;  %v597_v19 = vpop.f32.mrb[3].mxu1  ;;  %771 = vadd.xlane.f32.xlu0 %v1875_v14 }
 0x21e   :  { %v1880_v20 = vadd.f32 %v596_v15, %v1649_v9 }
 0x21f   :  { %v600_v1 = vpop.f32.mrb[4].mxu1 }
 0x220   :  { %v601_v0 = vadd.f32 %v1851_v34, %v600_v1  ;;  %v602_v22 = vpop.f32.mrb[5].mxu1  ;;  %773 = vadd.xlane.f32.xlu1 %v1880_v20 }
 0x222   :  { %v1885_v23 = vadd.f32 %v601_v0, %v1655_v13 }
 0x223   :  { %v605_v5 = vpop.f32.mrb[6].mxu1 }
 0x224   :  { %v606_v24 = vadd.f32 %v1851_v34, %v605_v5  ;;  %v607_v26 = vpop.f32.mrb[7].mxu1  ;;  %775 = vadd.xlane.f32.xlu0 %v1885_v23 }
 0x226   :  { %v1890_v27 = vadd.f32 %v606_v24, %v1661_v17 }
 0x227   :  { %v610_v9 = vpop.f32.mrb[8].mxu1 }
 0x228   :  { %v611_v28 = vadd.f32 %v1851_v34, %v610_v9  ;;  %v612_v30 = vpop.f32.mrb[9].mxu1  ;;  %777 = vadd.xlane.f32.xlu1 %v1890_v27 }
 0x22a   :  { %v1895_v31 = vadd.f32 %v611_v28, %v1667_v21 }
 0x22b   :  { %v615_v13 = vpop.f32.mrb[10].mxu1 }
 0x22c   :  { %v616_v32 = vadd.f32 %v1851_v34, %v615_v13  ;;  %v617_v35 = vpop.f32.mrb[11].mxu1  ;;  %779 = vadd.xlane.f32.xlu0 %v1895_v31 }
 0x22e   :  { %v1900_v36 = vadd.f32 %v616_v32, %v1673_v25 }
 0x22f   :  { %v620_v17 = vpop.f32.mrb[12].mxu1 }
 0x230   :  { %v621_v38 = vadd.f32 %v1851_v34, %v620_v17  ;;  %v622_v39 = vpop.f32.mrb[13].mxu1  ;;  %781 = vadd.xlane.f32.xlu1 %v1900_v36 }
 0x232   :  { %v1905_v18 = vadd.f32 %v621_v38, %v1679_v29 }
 0x233   :  { %v625_v21 = vpop.f32.mrb[14].mxu1 }
 0x234   :  { %v626_v40 = vadd.f32 %v1851_v34, %v625_v21  ;;  %v627_v50 = vpop.f32.mrb[15].mxu1  ;;  %783 = vadd.xlane.f32.xlu0 %v1905_v18 }
 0x236   :  { %v1910_v52 = vadd.f32 %v626_v40, %v1685_v33 }
 0x237   :  { %v630_v25 = vpop.f32.mrb[16].mxu1 }
 0x238   :  { %v631_v55 = vadd.f32 %v1851_v34, %v630_v25  ;;  %v632_v51 = vpop.f32.mrb[17].mxu1  ;;  %785 = vadd.xlane.f32.xlu1 %v1910_v52 }
 0x23a   :  { %v1915_v58 = vadd.f32 %v631_v55, %v1691_v37 }
 0x23b   :  { %v635_v29 = vpop.f32.mrb[18].mxu1 }
 0x23c   :  { %v636_v61 = vadd.f32 %v1851_v34, %v635_v29  ;;  %v637_v56 = vpop.f32.mrb[19].mxu1  ;;  %787 = vadd.xlane.f32.xlu0 %v1915_v58 }
 0x23e   :  { %v1920_v11 = vadd.f32 %v636_v61, %v1697_v41 }
 0x23f   :  { %v640_v33 = vpop.f32.mrb[20].mxu1 }
 0x240   :  { %v641_v12 = vadd.f32 %v1851_v34, %v640_v33  ;;  %v642_v60 = vpop.f32.mrb[21].mxu1  ;;  %789 = vadd.xlane.f32.xlu1 %v1920_v11 }
 0x242   :  { %v1925_v15 = vadd.f32 %v641_v12, %v1703_v43 }
 0x243   :  { %v645_v37 = vpop.f32.mrb[22].mxu1 }
 0x244   :  { %v646_v19 = vadd.f32 %v1851_v34, %v645_v37  ;;  %v647_v1 = vpop.f32.mrb[23].mxu1  ;;  %791 = vadd.xlane.f32.xlu0 %v1925_v15 }
 0x246   :  { %v1930_v0 = vadd.f32 %v646_v19, %v1708_v44 }
 0x247   :  { %v650_v41 = vpop.f32.mrb[24].mxu1 }
 0x248   :  { %v651_v22 = vadd.f32 %v1851_v34, %v650_v41  ;;  %v652_v5 = vpop.f32.mrb[25].mxu1  ;;  %793 = vadd.xlane.f32.xlu1 %v1930_v0 }
 0x24a   :  { %v1935_v24 = vadd.f32 %v651_v22, %v1712_v45 }
 0x24b   :  { %v655_v43 = vpop.f32.mrb[26].mxu1 }
 0x24c   :  { %v656_v26 = vadd.f32 %v1851_v34, %v655_v43  ;;  %v657_v9 = vpop.f32.mrb[27].mxu1  ;;  %795 = vadd.xlane.f32.xlu0 %v1935_v24 }
 0x24e   :  { %v1940_v28 = vadd.f32 %v656_v26, %v1716_v46 }
 0x24f   :  { %v660_v44 = vpop.f32.mrb[28].mxu1 }
 0x250   :  { %v661_v30 = vadd.f32 %v1851_v34, %v660_v44  ;;  %v662_v13 = vpop.f32.mrb[29].mxu1  ;;  %797 = vadd.xlane.f32.xlu1 %v1940_v28 }
 0x252   :  { %v1945_v32 = vadd.f32 %v661_v30, %v1720_v47 }
 0x253   :  { %v665_v45 = vpop.f32.mrb[30].mxu1 }
 0x254   :  { %v666_v35 = vadd.f32 %v1851_v34, %v665_v45  ;;  %v667_v17 = vpop.f32.mrb[31].mxu1  ;;  %799 = vadd.xlane.f32.xlu0 %v1945_v32 }
 0x256   :  { %v1950_v38 = vadd.f32 %v666_v35, %v1724_v48 }
 0x257   :  { %v670_v46 = vpop.f32.mrb[32].mxu1 }
 0x258   :  { %v671_v39 = vadd.f32 %v1851_v34, %v670_v46  ;;  %v672_v21 = vpop.f32.mrb[33].mxu1  ;;  %801 = vadd.xlane.f32.xlu1 %v1950_v38 }
 0x25a   :  { %v1955_v40 = vadd.f32 %v671_v39, %v1728_v49 }
 0x25b   :  { %v675_v47 = vpop.f32.mrb[34].mxu1 }
 0x25c   :  { %v676_v50 = vadd.f32 %v1851_v34, %v675_v47  ;;  %v677_v25 = vpop.f32.mrb[35].mxu1  ;;  %803 = vadd.xlane.f32.xlu0 %v1955_v40 }
 0x25e   :  { %v1960_v55 = vadd.f32 %v676_v50, %v1732_v54 }
 0x25f   :  { %v680_v48 = vpop.f32.mrb[36].mxu1 }
 0x260   :  { %v681_v51 = vadd.f32 %v1851_v34, %v680_v48  ;;  %v682_v29 = vpop.f32.mrb[37].mxu1  ;;  %805 = vadd.xlane.f32.xlu1 %v1960_v55 }
 0x262   :  { %v1965_v61 = vadd.f32 %v681_v51, %v1737_v59 }
 0x263   :  { %v685_v49 = vpop.f32.mrb[38].mxu1 }
 0x264   :  { %v686_v56 = vadd.f32 %v1851_v34, %v685_v49  ;;  %v687_v33 = vpop.f32.mrb[39].mxu1  ;;  %807 = vadd.xlane.f32.xlu0 %v1965_v61 }
 0x266   :  { %v1970_v12 = vadd.f32 %v686_v56, %v1742_v62 }
 0x267   :  { %v690_v54 = vpop.f32.mrb[40].mxu1 }
 0x268   :  { %v691_v60 = vadd.f32 %v1851_v34, %v690_v54  ;;  %v692_v37 = vpop.f32.mrb[41].mxu1  ;;  %809 = vadd.xlane.f32.xlu1 %v1970_v12 }
 0x26a   :  { %v1975_v19 = vadd.f32 %v691_v60, %v1746_v63 }
 0x26b   :  { %v695_v59 = vpop.f32.mrb[42].mxu1 }
 0x26c   :  { %v696_v1 = vadd.f32 %v1851_v34, %v695_v59  ;;  %v697_v41 = vpop.f32.mrb[43].mxu1  ;;  %811 = vadd.xlane.f32.xlu0 %v1975_v19 }
 0x26e   :  { %v1980_v22 = vadd.f32 %v696_v1, %v1750_v2 }
 0x26f   :  { %v700_v62 = vpop.f32.mrb[44].mxu1 }
 0x270   :  { %v701_v5 = vadd.f32 %v1851_v34, %v700_v62  ;;  %v702_v43 = vpop.f32.mrb[45].mxu1  ;;  %813 = vadd.xlane.f32.xlu1 %v1980_v22 }
 0x272   :  { %v1985_v26 = vadd.f32 %v701_v5, %v1754_v53 }
 0x273   :  { %v705_v63 = vpop.f32.mrb[46].mxu1 }
 0x274   :  { %v706_v9 = vadd.f32 %v1851_v34, %v705_v63  ;;  %v707_v44 = vpop.f32.mrb[47].mxu1  ;;  %815 = vadd.xlane.f32.xlu0 %v1985_v26 }
 0x276   :  { %v1990_v30 = vadd.f32 %v706_v9, %v1758_v3 }
 0x277   :  { %v710_v2 = vpop.f32.mrb[48].mxu1 }
 0x278   :  { %v711_v13 = vadd.f32 %v1851_v34, %v710_v2  ;;  %v712_v45 = vpop.f32.mrb[49].mxu1  ;;  %817 = vadd.xlane.f32.xlu1 %v1990_v30 }
 0x27a   :  { %v1995_v35 = vadd.f32 %v711_v13, %v1762_v4 }
 0x27b   :  { %v715_v53 = vpop.f32.mrb[50].mxu1 }
 0x27c   :  { %v716_v17 = vadd.f32 %v1851_v34, %v715_v53  ;;  %v717_v46 = vpop.f32.mrb[51].mxu1  ;;  %819 = vadd.xlane.f32.xlu0 %v1995_v35 }
 0x27e   :  { %v2000_v39 = vadd.f32 %v716_v17, %v1766_v6 }
 0x27f   :  { %v720_v3 = vpop.f32.mrb[52].mxu1 }
 0x280   :  { %v721_v21 = vadd.f32 %v1851_v34, %v720_v3  ;;  %v722_v47 = vpop.f32.mrb[53].mxu1  ;;  %821 = vadd.xlane.f32.xlu1 %v2000_v39 }
 0x282   :  { %v2005_v50 = vadd.f32 %v721_v21, %v1770_v7 }
 0x283   :  { %v725_v4 = vpop.f32.mrb[54].mxu1 }
 0x284   :  { %v726_v25 = vadd.f32 %v1851_v34, %v725_v4  ;;  %v727_v48 = vpop.f32.mrb[55].mxu1  ;;  %823 = vadd.xlane.f32.xlu0 %v2005_v50 }
 0x286   :  { %v2010_v51 = vadd.f32 %v726_v25, %v1774_v8 }
 0x288   :  { %825 = vadd.xlane.f32.xlu1 %v2010_v51 }
 0x299   :  { %v764_v6 = vpop.xlane.xlu0 %763 }
 0x29a   :  { %v828_v29 = vmul.f32 0.0078125, %v764_v6 }
 0x29c   :  { %v2014_v49 = vsub.f32 %v1855_v16, %v828_v29 }
 0x29d   :  { %v766_v56 = vpop.xlane.xlu0 %765 }
 0x29e   :  { %v829_v33 = vmul.f32 0.0078125, %v766_v56  ;;  %v892_v7 = vmul.f32 %v2014_v49, %v2014_v49 }
 0x2a0   :  { %v2019_v34 = vsub.f32 %v1860_v42, %v829_v33  ;;  %924 = vadd.xlane.f32.xlu0 %v892_v7 }
 0x2a1   :  { %v768_v54 = vpop.xlane.xlu1 %767 }
 0x2a2   :  { %v830_v60 = vmul.f32 0.0078125, %v768_v54  ;;  %v893_v8 = vmul.f32 %v2019_v34, %v2019_v34 }
 0x2a4   :  { %v2024_v37 = vsub.f32 %v1865_v57, %v830_v60  ;;  %926 = vadd.xlane.f32.xlu1 %v893_v8 }
 0x2a5   :  { %v770_v16 = vpop.xlane.xlu1 %769 }
 0x2a6   :  { %v831_v59 = vmul.f32 0.0078125, %v770_v16  ;;  %v894_v1 = vmul.f32 %v2024_v37, %v2024_v37 }
 0x2a8   :  { %v2029_v41 = vsub.f32 %v1870_v10, %v831_v59  ;;  %928 = vadd.xlane.f32.xlu0 %v894_v1 }
 0x2a9   :  { %v772_v42 = vpop.xlane.xlu0 %771 }
 0x2aa   :  { %v832_v62 = vmul.f32 0.0078125, %v772_v42  ;;  %v895_v5 = vmul.f32 %v2029_v41, %v2029_v41 }
 0x2ac   :  { %v2034_v43 = vsub.f32 %v1875_v14, %v832_v62  ;;  %930 = vadd.xlane.f32.xlu1 %v895_v5 }
 0x2ad   :  { %v774_v57 = vpop.xlane.xlu1 %773 }
 0x2ae   :  { %v833_v63 = vmul.f32 0.0078125, %v774_v57  ;;  %v896_v9 = vmul.f32 %v2034_v43, %v2034_v43 }
 0x2b0   :  { %v2039_v44 = vsub.f32 %v1880_v20, %v833_v63  ;;  %932 = vadd.xlane.f32.xlu0 %v896_v9 }
 0x2b1   :  { %v776_v10 = vpop.xlane.xlu0 %775 }
 0x2b2   :  { %v834_v2 = vmul.f32 0.0078125, %v776_v10  ;;  %v897_v13 = vmul.f32 %v2039_v44, %v2039_v44 }
 0x2b4   :  { %v2044_v45 = vsub.f32 %v1885_v23, %v834_v2  ;;  %934 = vadd.xlane.f32.xlu1 %v897_v13 }
 0x2b5   :  { %v778_v14 = vpop.xlane.xlu1 %777 }
 0x2b6   :  { %v835_v53 = vmul.f32 0.0078125, %v778_v14  ;;  %v898_v17 = vmul.f32 %v2044_v45, %v2044_v45 }
 0x2b8   :  { %v2049_v46 = vsub.f32 %v1890_v27, %v835_v53  ;;  %936 = vadd.xlane.f32.xlu0 %v898_v17 }
 0x2b9   :  { %v780_v20 = vpop.xlane.xlu0 %779 }
 0x2ba   :  { %v836_v3 = vmul.f32 0.0078125, %v780_v20  ;;  %v899_v21 = vmul.f32 %v2049_v46, %v2049_v46 }
 0x2bc   :  { %v2054_v47 = vsub.f32 %v1895_v31, %v836_v3  ;;  %938 = vadd.xlane.f32.xlu1 %v899_v21 }
 0x2bd   :  { %v782_v23 = vpop.xlane.xlu1 %781 }
 0x2be   :  { %v837_v4 = vmul.f32 0.0078125, %v782_v23  ;;  %v900_v25 = vmul.f32 %v2054_v47, %v2054_v47 }
 0x2c0   :  { %v2059_v48 = vsub.f32 %v1900_v36, %v837_v4  ;;  %940 = vadd.xlane.f32.xlu0 %v900_v25 }
 0x2c1   :  { %v784_v27 = vpop.xlane.xlu0 %783 }
 0x2c2   :  { %v838_v6 = vmul.f32 0.0078125, %v784_v27  ;;  %v901_v29 = vmul.f32 %v2059_v48, %v2059_v48 }
 0x2c4   :  { %v2064_v56 = vsub.f32 %v1905_v18, %v838_v6  ;;  %942 = vadd.xlane.f32.xlu1 %v901_v29 }
 0x2c5   :  { %v786_v31 = vpop.xlane.xlu1 %785 }
 0x2c6   :  { %v839_v33 = vmul.f32 0.0078125, %v786_v31  ;;  %v902_v7 = vmul.f32 %v2064_v56, %v2064_v56 }
 0x2c8   :  { %v2069_v54 = vsub.f32 %v1910_v52, %v839_v33  ;;  %944 = vadd.xlane.f32.xlu0 %v902_v7 }
 0x2c9   :  { %v788_v36 = vpop.xlane.xlu0 %787 }
 0x2ca   :  { %v840_v60 = vmul.f32 0.0078125, %v788_v36  ;;  %v903_v8 = vmul.f32 %v2069_v54, %v2069_v54 }
 0x2cc   :  { %v2074_v16 = vsub.f32 %v1915_v58, %v840_v60  ;;  %946 = vadd.xlane.f32.xlu1 %v903_v8 }
 0x2cd   :  { %v790_v18 = vpop.xlane.xlu1 %789 }
 0x2ce   :  { %v841_v59 = vmul.f32 0.0078125, %v790_v18  ;;  %v904_v1 = vmul.f32 %v2074_v16, %v2074_v16 }
 0x2d0   :  { %v2079_v42 = vsub.f32 %v1920_v11, %v841_v59  ;;  %948 = vadd.xlane.f32.xlu0 %v904_v1 }
 0x2d1   :  { %v792_v52 = vpop.xlane.xlu0 %791 }
 0x2d2   :  { %v842_v62 = vmul.f32 0.0078125, %v792_v52  ;;  %v905_v5 = vmul.f32 %v2079_v42, %v2079_v42 }
 0x2d4   :  { %v2084_v57 = vsub.f32 %v1925_v15, %v842_v62  ;;  %950 = vadd.xlane.f32.xlu1 %v905_v5 }
 0x2d5   :  { %v794_v58 = vpop.xlane.xlu1 %793 }
 0x2d6   :  { %v843_v63 = vmul.f32 0.0078125, %v794_v58  ;;  %v906_v9 = vmul.f32 %v2084_v57, %v2084_v57 }
 0x2d8   :  { %v2089_v10 = vsub.f32 %v1930_v0, %v843_v63  ;;  %952 = vadd.xlane.f32.xlu0 %v906_v9 }
 0x2d9   :  { %v796_v11 = vpop.xlane.xlu0 %795 }
 0x2da   :  { %v844_v2 = vmul.f32 0.0078125, %v796_v11  ;;  %v907_v13 = vmul.f32 %v2089_v10, %v2089_v10 }
 0x2dc   :  { %v2094_v14 = vsub.f32 %v1935_v24, %v844_v2  ;;  %954 = vadd.xlane.f32.xlu1 %v907_v13 }
 0x2dd   :  { %v798_v15 = vpop.xlane.xlu1 %797 }
 0x2de   :  { %v845_v53 = vmul.f32 0.0078125, %v798_v15  ;;  %v908_v17 = vmul.f32 %v2094_v14, %v2094_v14 }
 0x2e0   :  { %v2099_v20 = vsub.f32 %v1940_v28, %v845_v53  ;;  %956 = vadd.xlane.f32.xlu0 %v908_v17 }
 0x2e1   :  { %v800_v0 = vpop.xlane.xlu0 %799 }
 0x2e2   :  { %v846_v3 = vmul.f32 0.0078125, %v800_v0  ;;  %v909_v21 = vmul.f32 %v2099_v20, %v2099_v20 }
 0x2e4   :  { %v2104_v23 = vsub.f32 %v1945_v32, %v846_v3  ;;  %958 = vadd.xlane.f32.xlu1 %v909_v21 }
 0x2e5   :  { %v802_v24 = vpop.xlane.xlu1 %801 }
 0x2e6   :  { %v847_v4 = vmul.f32 0.0078125, %v802_v24  ;;  %v910_v25 = vmul.f32 %v2104_v23, %v2104_v23 }
 0x2e8   :  { %v2109_v27 = vsub.f32 %v1950_v38, %v847_v4  ;;  %960 = vadd.xlane.f32.xlu0 %v910_v25 }
 0x2e9   :  { %v804_v28 = vpop.xlane.xlu0 %803 }
 0x2ea   :  { %v848_v6 = vmul.f32 0.0078125, %v804_v28  ;;  %v911_v29 = vmul.f32 %v2109_v27, %v2109_v27 }
 0x2ec   :  { %v2114_v31 = vsub.f32 %v1955_v40, %v848_v6  ;;  %962 = vadd.xlane.f32.xlu1 %v911_v29 }
 0x2ed   :  { %v806_v32 = vpop.xlane.xlu1 %805 }
 0x2ee   :  { %v849_v33 = vmul.f32 0.0078125, %v806_v32  ;;  %v912_v7 = vmul.f32 %v2114_v31, %v2114_v31 }
 0x2f0   :  { %v2119_v36 = vsub.f32 %v1960_v55, %v849_v33  ;;  %964 = vadd.xlane.f32.xlu0 %v912_v7 }
 0x2f1   :  { %v808_v38 = vpop.xlane.xlu0 %807 }
 0x2f2   :  { %v850_v60 = vmul.f32 0.0078125, %v808_v38  ;;  %v913_v8 = vmul.f32 %v2119_v36, %v2119_v36 }
 0x2f4   :  { %v2124_v18 = vsub.f32 %v1965_v61, %v850_v60  ;;  %966 = vadd.xlane.f32.xlu1 %v913_v8 }
 0x2f5   :  { %v810_v40 = vpop.xlane.xlu1 %809 }
 0x2f6   :  { %v851_v59 = vmul.f32 0.0078125, %v810_v40  ;;  %v914_v1 = vmul.f32 %v2124_v18, %v2124_v18 }
 0x2f8   :  { %v2129_v52 = vsub.f32 %v1970_v12, %v851_v59  ;;  %968 = vadd.xlane.f32.xlu0 %v914_v1 }
 0x2f9   :  { %v812_v55 = vpop.xlane.xlu0 %811 }
 0x2fa   :  { %v852_v62 = vmul.f32 0.0078125, %v812_v55  ;;  %v915_v5 = vmul.f32 %v2129_v52, %v2129_v52 }
 0x2fc   :  { %v2134_v58 = vsub.f32 %v1975_v19, %v852_v62  ;;  %970 = vadd.xlane.f32.xlu1 %v915_v5 }
 0x2fd   :  { %v814_v61 = vpop.xlane.xlu1 %813 }
 0x2fe   :  { %v853_v63 = vmul.f32 0.0078125, %v814_v61  ;;  %v916_v9 = vmul.f32 %v2134_v58, %v2134_v58 }
 0x300   :  { %v2139_v11 = vsub.f32 %v1980_v22, %v853_v63  ;;  %972 = vadd.xlane.f32.xlu0 %v916_v9  ;;  %v2176_v9 = vld [vmem:[%s2299_s5] ss:$0 sm:$0xff]  ;;  %s1534_s5 = smov [#allocation8]  }
 0x301   :  { %v816_v12 = vpop.xlane.xlu0 %815 }
 0x302   :  { %v854_v2 = vmul.f32 0.0078125, %v816_v12  ;;  %v917_v13 = vmul.f32 %v2139_v11, %v2139_v11 }
 0x304   :  { %v2144_v15 = vsub.f32 %v1985_v26, %v854_v2  ;;  %974 = vadd.xlane.f32.xlu1 %v917_v13 }
 0x305   :  { %v818_v19 = vpop.xlane.xlu1 %817 }
 0x306   :  { %v855_v53 = vmul.f32 0.0078125, %v818_v19  ;;  %v918_v17 = vmul.f32 %v2144_v15, %v2144_v15  ;;  %v2182_v19 = vld [vmem:[%s2300_s6] ss:$0 sm:$0xff]  ;;  %s1229_s6 = sshll.u32 %s1534_s5, 4  ;;  %s1230_s6 = int_to_ptr.vmem [resolvable:$true] %s1229_s6 }
 0x307   :  { %s1497_s21 = scalar_lea.vmem %s1230_s6, 4096  ;;  %p1502_p11 = scmp.lt.s32.totalorder %s1230_s6, %s1230_s6 }
 0x308   :  { %v2149_v0 = vsub.f32 %v1990_v30, %v855_v53  ;;  %976 = vadd.xlane.f32.xlu0 %v918_v17  ;;  %p1498_p10 = scmp.ne.s32.totalorder %s1230_s6, %s1497_s21  ;;  %p1503_p12 = scmp.lt.s32.totalorder %s1497_s21, %s1497_s21 }
 0x309   :  { %v820_v22 = vpop.xlane.xlu0 %819 }
 0x30a   :  { %v856_v3 = vmul.f32 0.0078125, %v820_v22  ;;  %v919_v21 = vmul.f32 %v2149_v0, %v2149_v0  ;;  %p1504_p13 = por %p1503_p12, %p1502_p11 }
 0x30c   :  { %v2154_v24 = vsub.f32 %v1995_v35, %v856_v3  ;;  %978 = vadd.xlane.f32.xlu1 %v919_v21  ;;  %p1505_p0 = pnand %p1504_p13, %p1498_p10 }
 0x30d   :  { %v822_v26 = vpop.xlane.xlu1 %821 }
 0x30e   :  { %v857_v4 = vmul.f32 0.0078125, %v822_v26  ;;  %v920_v25 = vmul.f32 %v2154_v24, %v2154_v24 }
 0x310   :  { %v2159_v28 = vsub.f32 %v2000_v39, %v857_v4  ;;  %980 = vadd.xlane.f32.xlu0 %v920_v25 }
 0x311   :  { %v824_v30 = vpop.xlane.xlu0 %823 }
 0x312   :  { %v858_v6 = vmul.f32 0.0078125, %v824_v30  ;;  %v921_v29 = vmul.f32 %v2159_v28, %v2159_v28 }
 0x314   :  { %v2164_v32 = vsub.f32 %v2005_v50, %v858_v6  ;;  %982 = vadd.xlane.f32.xlu1 %v921_v29 }
 0x315   :  { %v826_v35 = vpop.xlane.xlu1 %825 }
 0x316   :  { %v859_v33 = vmul.f32 0.0078125, %v826_v35  ;;  %v922_v7 = vmul.f32 %v2164_v32, %v2164_v32 }
 0x318   :  { %v2169_v38 = vsub.f32 %v2010_v51, %v859_v33  ;;  %984 = vadd.xlane.f32.xlu0 %v922_v7 }
 0x31a   :  { %v923_v39 = vmul.f32 %v2169_v38, %v2169_v38 }
 0x31c   :  { %986 = vadd.xlane.f32.xlu1 %v923_v39 }
 0x32d   :  { %v925_v60 = vpop.xlane.xlu0 %924 }
 0x32e   :  { %v988_v8 = vmul.f32 0.0078125, %v925_v60 }
 0x330   :  { %v1020_v40 = vadd.f32 1e-05, %v988_v8 }
 0x331   :  { %v927_v59 = vpop.xlane.xlu1 %926 }
 0x332   :  { %1367 = vrsqrt.f32 %v1020_v40  ;;  %v989_v50 = vmul.f32 0.0078125, %v927_v59 }
 0x334   :  { %v1021_v1 = vadd.f32 1e-05, %v989_v50 }
 0x335   :  { %v929_v55 = vpop.xlane.xlu0 %928 }
 0x336   :  { %1369 = vrsqrt.f32 %v1021_v1  ;;  %v990_v62 = vmul.f32 0.0078125, %v929_v55 }
 0x338   :  { %v1022_v5 = vadd.f32 1e-05, %v990_v62 }
 0x339   :  { %v931_v61 = vpop.xlane.xlu1 %930 }
 0x33a   :  { %1371 = vrsqrt.f32 %v1022_v5  ;;  %v991_v51 = vmul.f32 0.0078125, %v931_v61 }
 0x33c   :  { %v1368_v63 = vpop.eup %1367  ;;  %v1023_v12 = vadd.f32 1e-05, %v991_v51 }
 0x33d   :  { %v1084_v2 = vmul.f32 %v1368_v63, %v2014_v49  ;;  %v933_v13 = vpop.xlane.xlu0 %932 }
 0x33e   :  { %1373 = vrsqrt.f32 %v1023_v12  ;;  %v992_v53 = vmul.f32 0.0078125, %v933_v13 }
 0x33f   :  { %v1122_v17 = vmul.f32 %v2176_v9, %v1084_v2 }
 0x340   :  { %v1370_v22 = vpop.eup %1369  ;;  %v1024_v3 = vadd.f32 1e-05, %v992_v53 }
 0x341   :  { %v1160_v21 = vadd.f32 %v2182_v19, %v1122_v17  ;;  %v1085_v26 = vmul.f32 %v1370_v22, %v2019_v34  ;;  %v935_v4 = vpop.xlane.xlu1 %934 }
 0x342   :  { %1375 = vrsqrt.f32 %v1024_v3  ;;  %v993_v25 = vmul.f32 0.0078125, %v935_v4 }
 0x343   :  { %1192 = vst [vmem:[#allocation8] sm:$0xff] %v1160_v21  ;;  %v1123_v49 = vmul.f32 %v2176_v9, %v1085_v26 }
 0x344   :  { %v1372_v30 = vpop.eup %1371  ;;  %v1025_v6 = vadd.f32 1e-05, %v993_v25 }
 0x345   :  { %v1161_v29 = vadd.f32 %v2182_v19, %v1123_v49  ;;  %v1086_v35 = vmul.f32 %v1372_v30, %v2024_v37  ;;  %v937_v33 = vpop.xlane.xlu0 %936 }
 0x346   :  { %1377 = vrsqrt.f32 %v1025_v6  ;;  %v994_v7 = vmul.f32 0.0078125, %v937_v33 }
 0x347   :  { %1193 = vst [vmem:[#allocation8 + $0x8] sm:$0xff] %v1161_v29  ;;  %v1124_v39 = vmul.f32 %v2176_v9, %v1086_v35 }
 0x348   :  { %v1374_v60 = vpop.eup %1373  ;;  %v1026_v34 = vadd.f32 1e-05, %v994_v7 }
 0x349   :  { %v1162_v8 = vadd.f32 %v2182_v19, %v1124_v39  ;;  %v1087_v40 = vmul.f32 %v1374_v60, %v2029_v41  ;;  %v939_v59 = vpop.xlane.xlu1 %938 }
 0x34a   :  { %1379 = vrsqrt.f32 %v1026_v34  ;;  %v995_v50 = vmul.f32 0.0078125, %v939_v59 }
 0x34b   :  { %1194 = vst [vmem:[#allocation8 + $0x10] sm:$0xff] %v1162_v8  ;;  %v1125_v1 = vmul.f32 %v2176_v9, %v1087_v40 }
 0x34c   :  { %v1376_v55 = vpop.eup %1375  ;;  %v1027_v37 = vadd.f32 1e-05, %v995_v50 }
 0x34d   :  { %v1163_v62 = vadd.f32 %v2182_v19, %v1125_v1  ;;  %v1088_v5 = vmul.f32 %v1376_v55, %v2034_v43  ;;  %v941_v61 = vpop.xlane.xlu0 %940 }
 0x34e   :  { %1381 = vrsqrt.f32 %v1027_v37  ;;  %v996_v51 = vmul.f32 0.0078125, %v941_v61 }
 0x34f   :  { %1195 = vst [vmem:[#allocation8 + $0x18] sm:$0xff] %v1163_v62  ;;  %v1126_v63 = vmul.f32 %v2176_v9, %v1088_v5 }
 0x350   :  { %v1378_v12 = vpop.eup %1377  ;;  %v1028_v41 = vadd.f32 1e-05, %v996_v51 }
 0x351   :  { %v1164_v2 = vadd.f32 %v2182_v19, %v1126_v63  ;;  %v1089_v13 = vmul.f32 %v1378_v12, %v2039_v44  ;;  %v943_v53 = vpop.xlane.xlu1 %942 }
 0x352   :  { %1383 = vrsqrt.f32 %v1028_v41  ;;  %v997_v17 = vmul.f32 0.0078125, %v943_v53 }
 0x353   :  { %1196 = vst [vmem:[#allocation8 + $0x20] sm:$0xff] %v1164_v2  ;;  %v1127_v22 = vmul.f32 %v2176_v9, %v1089_v13 }
 0x354   :  { %v1380_v3 = vpop.eup %1379  ;;  %v1029_v43 = vadd.f32 1e-05, %v997_v17 }
 0x355   :  { %v1165_v21 = vadd.f32 %v2182_v19, %v1127_v22  ;;  %v1090_v26 = vmul.f32 %v1380_v3, %v2044_v45  ;;  %v945_v4 = vpop.xlane.xlu0 %944 }
 0x356   :  { %1385 = vrsqrt.f32 %v1029_v43  ;;  %v998_v25 = vmul.f32 0.0078125, %v945_v4 }
 0x357   :  { %1197 = vst [vmem:[#allocation8 + $0x28] sm:$0xff] %v1165_v21  ;;  %v1128_v49 = vmul.f32 %v2176_v9, %v1090_v26 }
 0x358   :  { %v1382_v30 = vpop.eup %1381  ;;  %v1030_v44 = vadd.f32 1e-05, %v998_v25 }
 0x359   :  { %v1166_v6 = vadd.f32 %v2182_v19, %v1128_v49  ;;  %v1091_v29 = vmul.f32 %v1382_v30, %v2049_v46  ;;  %v947_v35 = vpop.xlane.xlu1 %946 }
 0x35a   :  { %1387 = vrsqrt.f32 %v1030_v44  ;;  %v999_v33 = vmul.f32 0.0078125, %v947_v35 }
 0x35b   :  { %1198 = vst [vmem:[#allocation8 + $0x30] sm:$0xff] %v1166_v6  ;;  %v1129_v7 = vmul.f32 %v2176_v9, %v1091_v29 }
 0x35c   :  { %v1384_v39 = vpop.eup %1383  ;;  %v1031_v45 = vadd.f32 1e-05, %v999_v33 }
 0x35d   :  { %v1167_v60 = vadd.f32 %v2182_v19, %v1129_v7  ;;  %v1092_v34 = vmul.f32 %v1384_v39, %v2054_v47  ;;  %v949_v8 = vpop.xlane.xlu0 %948 }
 0x35e   :  { %1389 = vrsqrt.f32 %v1031_v45  ;;  %v1000_v40 = vmul.f32 0.0078125, %v949_v8 }
 0x35f   :  { %1199 = vst [vmem:[#allocation8 + $0x38] sm:$0xff] %v1167_v60  ;;  %v1130_v59 = vmul.f32 %v2176_v9, %v1092_v34 }
 0x360   :  { %v1386_v50 = vpop.eup %1385  ;;  %v1032_v46 = vadd.f32 1e-05, %v1000_v40 }
 0x361   :  { %v1168_v1 = vadd.f32 %v2182_v19, %v1130_v59  ;;  %v1093_v55 = vmul.f32 %v1386_v50, %v2059_v48  ;;  %v951_v37 = vpop.xlane.xlu1 %950 }
 0x362   :  { %1391 = vrsqrt.f32 %v1032_v46  ;;  %v1001_v62 = vmul.f32 0.0078125, %v951_v37 }
 0x363   :  { %1200 = vst [vmem:[#allocation8 + $0x40] sm:$0xff] %v1168_v1  ;;  %v1131_v5 = vmul.f32 %v2176_v9, %v1093_v55 }
 0x364   :  { %v1388_v61 = vpop.eup %1387  ;;  %v1033_v47 = vadd.f32 1e-05, %v1001_v62 }
 0x365   :  { %v1169_v51 = vadd.f32 %v2182_v19, %v1131_v5  ;;  %v1094_v63 = vmul.f32 %v1388_v61, %v2064_v56  ;;  %v953_v12 = vpop.xlane.xlu0 %952 }
 0x366   :  { %1393 = vrsqrt.f32 %v1033_v47  ;;  %v1002_v41 = vmul.f32 0.0078125, %v953_v12 }
 0x367   :  { %1201 = vst [vmem:[#allocation8 + $0x48] sm:$0xff] %v1169_v51  ;;  %v1132_v2 = vmul.f32 %v2176_v9, %v1094_v63 }
 0x368   :  { %v1390_v13 = vpop.eup %1389  ;;  %v1034_v48 = vadd.f32 1e-05, %v1002_v41 }
 0x369   :  { %v1170_v53 = vadd.f32 %v2182_v19, %v1132_v2  ;;  %v1095_v17 = vmul.f32 %v1390_v13, %v2069_v54  ;;  %v955_v22 = vpop.xlane.xlu1 %954 }
 0x36a   :  { %1395 = vrsqrt.f32 %v1034_v48  ;;  %v1003_v3 = vmul.f32 0.0078125, %v955_v22 }
 0x36b   :  { %1202 = vst [vmem:[#allocation8 + $0x50] sm:$0xff] %v1170_v53  ;;  %v1133_v43 = vmul.f32 %v2176_v9, %v1095_v17 }
 0x36c   :  { %v1392_v21 = vpop.eup %1391  ;;  %v1035_v56 = vadd.f32 1e-05, %v1003_v3 }
 0x36d   :  { %v1171_v26 = vadd.f32 %v2182_v19, %v1133_v43  ;;  %v1096_v4 = vmul.f32 %v1392_v21, %v2074_v16  ;;  %v957_v25 = vpop.xlane.xlu0 %956 }
 0x36e   :  { %1397 = vrsqrt.f32 %v1035_v56  ;;  %v1004_v49 = vmul.f32 0.0078125, %v957_v25 }
 0x36f   :  { %1203 = vst [vmem:[#allocation8 + $0x58] sm:$0xff] %v1171_v26  ;;  %v1134_v30 = vmul.f32 %v2176_v9, %v1096_v4 }
 0x370   :  { %v1394_v44 = vpop.eup %1393  ;;  %v1036_v54 = vadd.f32 1e-05, %v1004_v49 }
 0x371   :  { %v1172_v6 = vadd.f32 %v2182_v19, %v1134_v30  ;;  %v1097_v29 = vmul.f32 %v1394_v44, %v2079_v42  ;;  %v959_v35 = vpop.xlane.xlu1 %958 }
 0x372   :  { %1399 = vrsqrt.f32 %v1036_v54  ;;  %v1005_v33 = vmul.f32 0.0078125, %v959_v35 }
 0x373   :  { %1204 = vst [vmem:[#allocation8 + $0x60] sm:$0xff] %v1172_v6  ;;  %v1135_v7 = vmul.f32 %v2176_v9, %v1097_v29 }
 0x374   :  { %v1396_v39 = vpop.eup %1395  ;;  %v1037_v16 = vadd.f32 1e-05, %v1005_v33 }
 0x375   :  { %v1173_v45 = vadd.f32 %v2182_v19, %v1135_v7  ;;  %v1098_v60 = vmul.f32 %v1396_v39, %v2084_v57  ;;  %v961_v34 = vpop.xlane.xlu0 %960 }
 0x376   :  { %1401 = vrsqrt.f32 %v1037_v16  ;;  %v1006_v8 = vmul.f32 0.0078125, %v961_v34 }
 0x377   :  { %1205 = vst [vmem:[#allocation8 + $0x68] sm:$0xff] %v1173_v45  ;;  %v1136_v40 = vmul.f32 %v2176_v9, %v1098_v60 }
 0x378   :  { %v1398_v59 = vpop.eup %1397  ;;  %v1038_v42 = vadd.f32 1e-05, %v1006_v8 }
 0x379   :  { %v1174_v50 = vadd.f32 %v2182_v19, %v1136_v40  ;;  %v1099_v46 = vmul.f32 %v1398_v59, %v2089_v10  ;;  %v963_v1 = vpop.xlane.xlu1 %962 }
 0x37a   :  { %1403 = vrsqrt.f32 %v1038_v42  ;;  %v1007_v55 = vmul.f32 0.0078125, %v963_v1 }
 0x37b   :  { %1206 = vst [vmem:[#allocation8 + $0x70] sm:$0xff] %v1174_v50  ;;  %v1137_v37 = vmul.f32 %v2176_v9, %v1099_v46 }
 0x37c   :  { %v1400_v62 = vpop.eup %1399  ;;  %v1039_v57 = vadd.f32 1e-05, %v1007_v55 }
 0x37d   :  { %v1175_v5 = vadd.f32 %v2182_v19, %v1137_v37  ;;  %v1100_v61 = vmul.f32 %v1400_v62, %v2094_v14  ;;  %v965_v47 = vpop.xlane.xlu0 %964 }
 0x37e   :  { %1405 = vrsqrt.f32 %v1039_v57  ;;  %v1008_v51 = vmul.f32 0.0078125, %v965_v47 }
 0x37f   :  { %1207 = vst [vmem:[#allocation8 + $0x78] sm:$0xff] %v1175_v5  ;;  %v1138_v63 = vmul.f32 %v2176_v9, %v1100_v61 }
 0x380   :  { %v1402_v12 = vpop.eup %1401  ;;  %v1040_v10 = vadd.f32 1e-05, %v1008_v51 }
 0x381   :  { %v1176_v41 = vadd.f32 %v2182_v19, %v1138_v63  ;;  %v1101_v2 = vmul.f32 %v1402_v12, %v2099_v20  ;;  %v967_v13 = vpop.xlane.xlu1 %966 }
 0x382   :  { %1407 = vrsqrt.f32 %v1040_v10  ;;  %v1009_v48 = vmul.f32 0.0078125, %v967_v13 }
 0x383   :  { %1208 = vst [vmem:[#allocation8 + $0x80] sm:$0xff] %v1176_v41  ;;  %v1139_v53 = vmul.f32 %v2176_v9, %v1101_v2 }
 0x384   :  { %v1404_v17 = vpop.eup %1403  ;;  %v1041_v14 = vadd.f32 1e-05, %v1009_v48 }
 0x385   :  { %v1177_v22 = vadd.f32 %v2182_v19, %v1139_v53  ;;  %v1102_v3 = vmul.f32 %v1404_v17, %v2104_v23  ;;  %v969_v43 = vpop.xlane.xlu0 %968 }
 0x386   :  { %1409 = vrsqrt.f32 %v1041_v14  ;;  %v1010_v21 = vmul.f32 0.0078125, %v969_v43 }
 0x387   :  { %1209 = vst [vmem:[#allocation8 + $0x88] sm:$0xff] %v1177_v22  ;;  %v1140_v56 = vmul.f32 %v2176_v9, %v1102_v3 }
 0x388   :  { %v1406_v26 = vpop.eup %1405  ;;  %v1042_v20 = vadd.f32 1e-05, %v1010_v21 }
 0x389   :  { %v1178_v4 = vadd.f32 %v2182_v19, %v1140_v56  ;;  %v1103_v25 = vmul.f32 %v1406_v26, %v2109_v27  ;;  %v971_v49 = vpop.xlane.xlu1 %970 }
 0x38a   :  { %1411 = vrsqrt.f32 %v1042_v20  ;;  %v1011_v30 = vmul.f32 0.0078125, %v971_v49 }
 0x38b   :  { %1210 = vst [vmem:[#allocation8 + $0x90] sm:$0xff] %v1178_v4  ;;  %v1141_v44 = vmul.f32 %v2176_v9, %v1103_v25 }
 0x38c   :  { %v1408_v54 = vpop.eup %1407  ;;  %v1043_v23 = vadd.f32 1e-05, %v1011_v30 }
 0x38d   :  { %v1179_v6 = vadd.f32 %v2182_v19, %v1141_v44  ;;  %v1104_v29 = vmul.f32 %v1408_v54, %v2114_v31  ;;  %v973_v35 = vpop.xlane.xlu0 %972 }
 0x38e   :  { %1413 = vrsqrt.f32 %v1043_v23  ;;  %v1012_v33 = vmul.f32 0.0078125, %v973_v35 }
 0x38f   :  { %1211 = vst [vmem:[#allocation8 + $0x98] sm:$0xff] %v1179_v6  ;;  %v1142_v7 = vmul.f32 %v2176_v9, %v1104_v29 }
 0x390   :  { %v1410_v39 = vpop.eup %1409  ;;  %v1044_v27 = vadd.f32 1e-05, %v1012_v33 }
 0x391   :  { %v1180_v16 = vadd.f32 %v2182_v19, %v1142_v7  ;;  %v1105_v45 = vmul.f32 %v1410_v39, %v2119_v36  ;;  %v975_v60 = vpop.xlane.xlu1 %974 }
 0x392   :  { %1415 = vrsqrt.f32 %v1044_v27  ;;  %v1013_v34 = vmul.f32 0.0078125, %v975_v60 }
 0x393   :  { %1212 = vst [vmem:[#allocation8 + $0xa0] sm:$0xff] %v1180_v16  ;;  %v1143_v8 = vmul.f32 %v2176_v9, %v1105_v45 }
 0x394   :  { %v1412_v40 = vpop.eup %1411  ;;  %v1045_v31 = vadd.f32 1e-05, %v1013_v34 }
 0x395   :  { %v1181_v59 = vadd.f32 %v2182_v19, %v1143_v8  ;;  %v1106_v42 = vmul.f32 %v1412_v40, %v2124_v18  ;;  %v977_v50 = vpop.xlane.xlu0 %976 }
 0x396   :  { %1417 = vrsqrt.f32 %v1045_v31  ;;  %v1014_v46 = vmul.f32 0.0078125, %v977_v50 }
 0x397   :  { %1213 = vst [vmem:[#allocation8 + $0xa8] sm:$0xff] %v1181_v59  ;;  %v1144_v1 = vmul.f32 %v2176_v9, %v1106_v42 }
 0x398   :  { %v1414_v55 = vpop.eup %1413  ;;  %v1046_v36 = vadd.f32 1e-05, %v1014_v46 }
 0x399   :  { %v1182_v37 = vadd.f32 %v2182_v19, %v1144_v1  ;;  %v1107_v62 = vmul.f32 %v1414_v55, %v2129_v52  ;;  %v979_v57 = vpop.xlane.xlu1 %978 }
 0x39a   :  { %1419 = vrsqrt.f32 %v1046_v36  ;;  %v1015_v5 = vmul.f32 0.0078125, %v979_v57 }
 0x39b   :  { %1214 = vst [vmem:[#allocation8 + $0xb0] sm:$0xff] %v1182_v37  ;;  %v1145_v61 = vmul.f32 %v2176_v9, %v1107_v62 }
 0x39c   :  { %v1416_v47 = vpop.eup %1415  ;;  %v1047_v18 = vadd.f32 1e-05, %v1015_v5 }
 0x39d   :  { %v1183_v51 = vadd.f32 %v2182_v19, %v1145_v61  ;;  %v1108_v63 = vmul.f32 %v1416_v47, %v2134_v58  ;;  %v981_v12 = vpop.xlane.xlu0 %980 }
 0x39e   :  { %1421 = vrsqrt.f32 %v1047_v18  ;;  %v1016_v10 = vmul.f32 0.0078125, %v981_v12 }
 0x39f   :  { %1215 = vst [vmem:[#allocation8 + $0xb8] sm:$0xff] %v1183_v51  ;;  %v1146_v41 = vmul.f32 %v2176_v9, %v1108_v63 }
 0x3a0   :  { %v1418_v2 = vpop.eup %1417  ;;  %v1048_v52 = vadd.f32 1e-05, %v1016_v10 }
 0x3a1   :  { %v1184_v13 = vadd.f32 %v2182_v19, %v1146_v41  ;;  %v1109_v48 = vmul.f32 %v1418_v2, %v2139_v11  ;;  %v983_v53 = vpop.xlane.xlu1 %982 }
 0x3a2   :  { %1423 = vrsqrt.f32 %v1048_v52  ;;  %v1017_v17 = vmul.f32 0.0078125, %v983_v53 }
 0x3a3   :  { %1216 = vst [vmem:[#allocation8 + $0xc0] sm:$0xff] %v1184_v13  ;;  %v1147_v14 = vmul.f32 %v2176_v9, %v1109_v48 }
 0x3a4   :  { %v1420_v22 = vpop.eup %1419  ;;  %v1049_v58 = vadd.f32 1e-05, %v1017_v17 }
 0x3a5   :  { %v1185_v3 = vadd.f32 %v2182_v19, %v1147_v14  ;;  %v1110_v43 = vmul.f32 %v1420_v22, %v2144_v15  ;;  %v985_v21 = vpop.xlane.xlu0 %984 }
 0x3a6   :  { %1425 = vrsqrt.f32 %v1049_v58  ;;  %v1018_v56 = vmul.f32 0.0078125, %v985_v21 }
 0x3a7   :  { %1217 = vst [vmem:[#allocation8 + $0xc8] sm:$0xff] %v1185_v3  ;;  %v1148_v26 = vmul.f32 %v2176_v9, %v1110_v43 }
 0x3a8   :  { %v1422_v20 = vpop.eup %1421  ;;  %v1050_v11 = vadd.f32 1e-05, %v1018_v56 }
 0x3a9   :  { %v1186_v4 = vadd.f32 %v2182_v19, %v1148_v26  ;;  %v1111_v25 = vmul.f32 %v1422_v20, %v2149_v0  ;;  %v987_v49 = vpop.xlane.xlu1 %986 }
 0x3aa   :  { %1427 = vrsqrt.f32 %v1050_v11  ;;  %v1019_v30 = vmul.f32 0.0078125, %v987_v49 }
 0x3ab   :  { %1218 = vst [vmem:[#allocation8 + $0xd0] sm:$0xff] %v1186_v4  ;;  %v1149_v44 = vmul.f32 %v2176_v9, %v1111_v25 }
 0x3ac   :  { %v1424_v54 = vpop.eup %1423  ;;  %v1051_v15 = vadd.f32 1e-05, %v1019_v30 }
 0x3ad   :  { %v1187_v23 = vadd.f32 %v2182_v19, %v1149_v44  ;;  %v1112_v6 = vmul.f32 %v1424_v54, %v2154_v24 }
 0x3ae   :  { %1429 = vrsqrt.f32 %v1051_v15 }
 0x3af   :  { %1219 = vst [vmem:[#allocation8 + $0xd8] sm:$0xff] %v1187_v23  ;;  %v1150_v29 = vmul.f32 %v2176_v9, %v1112_v6 }
 0x3b0   :  { %v1426_v35 = vpop.eup %1425 }
 0x3b1   :  { %v1188_v33 = vadd.f32 %v2182_v19, %v1150_v29  ;;  %v1113_v0 = vmul.f32 %v1426_v35, %v2159_v28 }
 0x3b3   :  { %1220 = vst [vmem:[#allocation8 + $0xe0] sm:$0xff] %v1188_v33  ;;  %v1151_v7 = vmul.f32 %v2176_v9, %v1113_v0 }
 0x3b4   :  { %v1428_v39 = vpop.eup %1427 }
 0x3b5   :  { %v1189_v27 = vadd.f32 %v2182_v19, %v1151_v7  ;;  %v1114_v16 = vmul.f32 %v1428_v39, %v2164_v32 }
 0x3b7   :  { %1221 = vst [vmem:[#allocation8 + $0xe8] sm:$0xff] %v1189_v27  ;;  %v1152_v24 = vmul.f32 %v2176_v9, %v1114_v16 }
 0x3b8   :  { %v1430_v45 = vpop.eup %1429 }
 0x3b9   :  { %v1190_v60 = vadd.f32 %v2182_v19, %v1152_v24  ;;  %v1115_v34 = vmul.f32 %v1430_v45, %v2169_v38 }
 0x3bb   :  { %1222 = vst [vmem:[#allocation8 + $0xf0] sm:$0xff] %v1190_v60  ;;  %v1153_v28 = vmul.f32 %v2176_v9, %v1115_v34 }
 0x3bd   :  { %v1191_v8 = vadd.f32 %v2182_v19, %v1153_v28 }
 0x3bf   :  { %1223 = vst [vmem:[#allocation8 + $0xf8] sm:$0xff] %v1191_v8 }
 0x3c0   :  { %1508 = shalt.err (!%p1505_p0)
}
 0x3c1   :  { %s1509_s24 = scalar_lea.hbm %s2301_s7, 4096 }
 0x3c2   :  { %p1510_p1 = scmp.ne.s32.totalorder %s2301_s7, %s1509_s24  ;;  %p1513_p2 = scmp.lt.u32.totalorder %s1509_s24, %s2301_s7 }
 0x3c4   :  { %p1515_p3 = pnand %p1513_p2, %p1510_p1 }
 0x3c6   :  { %1518 = shalt.err (!%p1515_p3)
}
 0x3c7   :  { %1235 = dma.vmem_to_hbm [thread:$0]  %s1230_s6, 4096, %s2301_s7, [#allocation4], %s1529_s1, %s1529_s1, %s1530_s25  }
 0x3c8   :  { %1523 = dma.done.wait [#allocation4], 4096  }
 0x3c9   :  { %1524 = vsyncadd [#allocation4], 4294963200 }
 0x3ca   :  { %1239 = vsyncpa [#allocation3], 1 }
 0x3cb   :  { %1240 = vsyncpa [#allocation6], 1 }
 0x3cc   :  { %1241 = vsyncpa [#allocation4], 1 }

</bundles_post_ra>
